<compile_context>
chip_gen: v6e
topology: v6e:2x2x1
jax: 0.10.0
libtpu: 0.0.40
codegen_flags: <defaults>
</compile_context>

<pallas_src>
import math

import jax
import jax.numpy as jnp
from jax.experimental import pallas as pl
from jax.experimental.pallas import tpu as pltpu

# ---- model hyper-parameters (small, consistent with the module) ----
B = 2          # batch
LT = 8         # target sequence length
LM = 16        # memory sequence length
D_MODEL = 32   # d_model
N_HEAD = 4     # n_head
HEAD_DIM = D_MODEL // N_HEAD
D_FF = 4 * D_MODEL
LN_EPS = 1e-5

# ---- packed-parameter slab layout (all offsets static) ----
# mat_slab: (D_MODEL, 384) f32 — weights, pre-transposed, packed along lanes.
_W1_C0 = 0        # [:,   0:128]  ffn linear1 weight^T   (32, 128)
_SA_QKV_C0 = 128  # [:, 128:224]  self-attn in_proj^T    (32, 96)   [Wq|Wk|Wv]
_SA_WO_C0 = 224   # [:, 224:256]  self-attn out_proj^T   (32, 32)
_CA_WQ_C0 = 256   # [:, 256:288]  cross-attn Wq^T        (32, 32)
_CA_WKV_C0 = 288  # [:, 288:352]  cross-attn [Wk|Wv]^T   (32, 64)
_CA_WO_C0 = 352   # [:, 352:384]  cross-attn out_proj^T  (32, 32)
_MAT_COLS = 384

# vec_slab: (16, 128) f32 — one parameter vector per row (padded to 128 lanes).
_R_B1 = 0        # ffn linear1 bias          (128,)
_R_SA_BQKV = 1   # self-attn in_proj bias    (96,)
_R_SA_BO = 2     # self-attn out_proj bias   (32,)
_R_CA_BQ = 3     # cross-attn q bias         (32,)
_R_CA_BKV = 4    # cross-attn k/v bias       (64,)
_R_CA_BO = 5     # cross-attn out_proj bias  (32,)
_R_B2 = 6        # ffn linear2 bias          (32,)
_R_N1_G, _R_N1_B = 7, 8
_R_N2_G, _R_N2_B = 9, 10
_R_N3_G, _R_N3_B = 11, 12
_VEC_ROWS = 16


# --------------------------------------------------------------------------------------
# in-kernel helpers (values only; leading-dim reshapes + static lane slices only)
# --------------------------------------------------------------------------------------
def _layernorm(x, g, b):
    """PyTorch LayerNorm over the last dim (biased variance, eps inside sqrt)."""
    mu = jnp.mean(x, axis=-1, keepdims=True)
    var = jnp.mean(jnp.square(x - mu), axis=-1, keepdims=True)
    return (x - mu) * jax.lax.rsqrt(var + LN_EPS) * g + b


def _softmax(s):
    s = s - jnp.max(s, axis=-1, keepdims=True)
    p = jnp.exp(s)
    return p / jnp.sum(p, axis=-1, keepdims=True)     # exact (matches torch closely)


def _mha(q2, k2, v2, lq, lk):
    """Multi-head attention on lane-packed projections.

    q2: (B*lq, D) already scaled by 1/sqrt(head_dim); k2, v2: (B*lk, D).
    Heads are contiguous lane slices of width HEAD_DIM. Returns (B*lq, D) with
    heads concatenated along lanes (== torch's concat-of-heads layout)."""
    q3 = q2.reshape(B, lq, D_MODEL)
    k3 = k2.reshape(B, lk, D_MODEL)
    v3 = v2.reshape(B, lk, D_MODEL)
    outs = []
    for h in range(N_HEAD):                      # static unrolled loop, no replication
        lo, hi = h * HEAD_DIM, (h + 1) * HEAD_DIM
        s = jnp.einsum('bqe,bke->bqk', q3[..., lo:hi], k3[..., lo:hi],
                       preferred_element_type=jnp.float32)        # (B, lq, lk)
        p = _softmax(s)
        outs.append(jnp.einsum('bqk,bke->bqe', p, v3[..., lo:hi],
                               preferred_element_type=jnp.float32))
    o = jnp.concatenate(outs, axis=-1)                            # (B, lq, D)
    return o.reshape(B * lq, D_MODEL)


# --------------------------------------------------------------------------------------
# kernel
# --------------------------------------------------------------------------------------
def decoder_layer_kernel(tgt_ref, mem_ref, mat_ref, w2_ref, vec_ref, out_ref):
    scale = 1.0 / math.sqrt(HEAD_DIM)
    d = D_MODEL

    x = tgt_ref[...].reshape(B * LT, d)          # (16, 32)  merged-row view
    mem2 = mem_ref[...].reshape(B * LM, d)       # (32, 32)

    # ---- self-attention + residual + norm1 ----
    qkv = jnp.dot(x, mat_ref[:, _SA_QKV_C0:_SA_QKV_C0 + 3 * d],
                  preferred_element_type=jnp.float32) \
        + vec_ref[_R_SA_BQKV:_R_SA_BQKV + 1, 0:3 * d]             # (16, 96)
    o = _mha(qkv[:, 0:d] * scale, qkv[:, d:2 * d], qkv[:, 2 * d:3 * d], LT, LT)
    sa = jnp.dot(o, mat_ref[:, _SA_WO_C0:_SA_WO_C0 + d],
                 preferred_element_type=jnp.float32) \
        + vec_ref[_R_SA_BO:_R_SA_BO + 1, 0:d]
    x = _layernorm(x + sa,                                         # dropout1 = identity
                   vec_ref[_R_N1_G:_R_N1_G + 1, 0:d],
                   vec_ref[_R_N1_B:_R_N1_B + 1, 0:d])

    # ---- cross-attention (query pre-normed with norm2, as in the module) ----
    n2_g = vec_ref[_R_N2_G:_R_N2_G + 1, 0:d]
    n2_b = vec_ref[_R_N2_B:_R_N2_B + 1, 0:d]
    q_in = _layernorm(x, n2_g, n2_b)
    q = jnp.dot(q_in, mat_ref[:, _CA_WQ_C0:_CA_WQ_C0 + d],
                preferred_element_type=jnp.float32) \
        + vec_ref[_R_CA_BQ:_R_CA_BQ + 1, 0:d]                     # (16, 32)
    kv = jnp.dot(mem2, mat_ref[:, _CA_WKV_C0:_CA_WKV_C0 + 2 * d],
                 preferred_element_type=jnp.float32) \
        + vec_ref[_R_CA_BKV:_R_CA_BKV + 1, 0:2 * d]               # (32, 64)
    o = _mha(q * scale, kv[:, 0:d], kv[:, d:2 * d], LT, LM)
    ca = jnp.dot(o, mat_ref[:, _CA_WO_C0:_CA_WO_C0 + d],
                 preferred_element_type=jnp.float32) \
        + vec_ref[_R_CA_BO:_R_CA_BO + 1, 0:d]
    x = x + ca                                                     # dropout2 = identity
    # norm2 is applied a second time here — this matches the reference module.
    x = _layernorm(x, n2_g, n2_b)

    # ---- feed-forward (Linear -> ReLU -> Linear) + residual + norm3 ----
    h = jnp.dot(x, mat_ref[:, _W1_C0:_W1_C0 + D_FF],
                preferred_element_type=jnp.float32) + vec_ref[_R_B1:_R_B1 + 1, :]
    h = jnp.maximum(h, 0.0)
    ff = jnp.dot(h, w2_ref[...], preferred_element_type=jnp.float32) \
        + vec_ref[_R_B2:_R_B2 + 1, 0:d]
    x = _layernorm(x + ff,                                         # ffn dropout = identity
                   vec_ref[_R_N3_G:_R_N3_G + 1, 0:d],
                   vec_ref[_R_N3_B:_R_N3_B + 1, 0:d])

    out_ref[...] = x.reshape(B, LT, d).astype(out_ref.dtype)


# --------------------------------------------------------------------------------------
# one-time wrapper-side packing (run once at "model load", NOT in the per-call jit path)
# --------------------------------------------------------------------------------------
def pack_params(params):
    (sa_w_in, sa_b_in, sa_w_out, sa_b_out,
     ca_w_in, ca_b_in, ca_w_out, ca_b_out,
     n1_g, n1_b, n2_g, n2_b, n3_g, n3_b,
     ffn_w1, ffn_b1, ffn_w2, ffn_b2) = params
    d = D_MODEL

    mat = jnp.concatenate([
        ffn_w1.T,            # (32, 128)  linear1
        sa_w_in.T,           # (32, 96)   [Wq|Wk|Wv]
        sa_w_out.T,          # (32, 32)
        ca_w_in[:d].T,       # (32, 32)   Wq
        ca_w_in[d:].T,       # (32, 64)   [Wk|Wv]
        ca_w_out.T,          # (32, 32)
    ], axis=1).astype(jnp.float32)
    assert mat.shape == (d, _MAT_COLS)

    def row(v):
        v = v.astype(jnp.float32)
        return jnp.pad(v, (0, 128 - v.shape[0]))[None, :]

    vec = jnp.concatenate([
        row(ffn_b1), row(sa_b_in), row(sa_b_out),
        row(ca_b_in[:d]), row(ca_b_in[d:]), row(ca_b_out),
        row(ffn_b2),
        row(n1_g), row(n1_b), row(n2_g), row(n2_b), row(n3_g), row(n3_b),
        jnp.zeros((_VEC_ROWS - 13, 128), jnp.float32),
    ], axis=0)
    assert vec.shape == (_VEC_ROWS, 128)

    w2 = ffn_w2.T.astype(jnp.float32)     # (128, 32)
    return mat, w2, vec


@jax.jit
def transformer_decoder_layer(target, memory, mat_slab, w2, vec_slab):
    batch, lt, d = target.shape
    lm = memory.shape[1]
    d_ff = w2.shape[0]
    nh, hd = N_HEAD, HEAD_DIM

    # advisory cost so XLA schedules this tiny custom call sensibly
    flops = 2 * batch * (
        lt * d * 3 * d                          # self-attn fused qkv projection
        + nh * lt * lt * hd * 2                 # self-attn scores + values
        + lt * d * d                            # self-attn out projection
        + lt * d * d                            # cross-attn q projection
        + lm * d * 2 * d                        # cross-attn fused kv projection
        + nh * lt * lm * hd * 2                 # cross-attn scores + values
        + lt * d * d                            # cross-attn out projection
        + 2 * lt * d * d_ff                     # feed-forward
    )
    transcendentals = batch * nh * (lt * lt + lt * lm)             # softmax exps
    inputs = (target, memory, mat_slab, w2, vec_slab)
    bytes_accessed = sum(a.size * a.dtype.itemsize for a in inputs) + batch * lt * d * 4

    # Gridless call: whole problem in VMEM, 5 input DMAs, no per-step overhead.
    return pl.pallas_call(
        decoder_layer_kernel,
        out_shape=jax.ShapeDtypeStruct((batch, lt, d), jnp.float32),
        cost_estimate=pl.CostEstimate(
            flops=int(flops),
            transcendentals=int(transcendentals),
            bytes_accessed=int(bytes_accessed),
        ),
    )(*inputs)


# --------------------------------------------------------------------------------------
# deterministic example parameters (PyTorch-native shapes)
# --------------------------------------------------------------------------------------
def make_params(key):
    def nrm(k, shape, scale=0.05):
        return scale * jax.random.normal(k, shape, dtype=jnp.float32)

    ks = jax.random.split(key, 12)
    return (
        nrm(ks[0], (3 * D_MODEL, D_MODEL)),               # self-attn in_proj_weight
        nrm(ks[1], (3 * D_MODEL,)),                       # self-attn in_proj_bias
        nrm(ks[2], (D_MODEL, D_MODEL)),                   # self-attn out_proj.weight
        nrm(ks[3], (D_MODEL,)),                           # self-attn out_proj.bias
        nrm(ks[4], (3 * D_MODEL, D_MODEL)),               # cross-attn in_proj_weight
        nrm(ks[5], (3 * D_MODEL,)),                       # cross-attn in_proj_bias
        nrm(ks[6], (D_MODEL, D_MODEL)),                   # cross-attn out_proj.weight
        nrm(ks[7], (D_MODEL,)),                           # cross-attn out_proj.bias
        jnp.ones((D_MODEL,), jnp.float32), jnp.zeros((D_MODEL,), jnp.float32),   # norm1
        jnp.ones((D_MODEL,), jnp.float32), jnp.zeros((D_MODEL,), jnp.float32),   # norm2
        jnp.ones((D_MODEL,), jnp.float32), jnp.zeros((D_MODEL,), jnp.float32),   # norm3
        nrm(ks[8], (D_FF, D_MODEL)),                      # ffn linear1.weight
        nrm(ks[9], (D_FF,)),                              # ffn linear1.bias
        nrm(ks[10], (D_MODEL, D_FF)),                     # ffn linear2.weight
        nrm(ks[11], (D_MODEL,)),                          # ffn linear2.bias
    )


if __name__ == "__main__":
    key = jax.random.PRNGKey(0)
    k_t, k_m, k_p = jax.random.split(key, 3)

    target = jax.random.normal(k_t, (B, LT, D_MODEL), dtype=jnp.float32)
    memory = jax.random.normal(k_m, (B, LM, D_MODEL), dtype=jnp.float32)
    params = make_params(k_p)

    # one-time packing (model-load time), kept out of the jitted per-call path
    mat_slab, w2, vec_slab = pack_params(params)
    mat_slab, w2, vec_slab = jax.block_until_ready((mat_slab, w2, vec_slab))

    out = transformer_decoder_layer(target, memory, mat_slab, w2, vec_slab)
    jax.block_until_ready(out)

    assert out.shape == (B, LT, D_MODEL)
    assert bool(jnp.all(jnp.isfinite(out)))
    print("KERNEL_OK")
</pallas_src>

<mosaic_0001>
module attributes {stable_mosaic.version = 11 : i64} {
  func.func @decoder_layer_kernel(%arg0: memref<2x8x32xf32, #tpu.memory_space<vmem>>, %arg1: memref<2x16x32xf32, #tpu.memory_space<vmem>>, %arg2: memref<32x384xf32, #tpu.memory_space<vmem>>, %arg3: memref<128x32xf32, #tpu.memory_space<vmem>>, %arg4: memref<16x128xf32, #tpu.memory_space<vmem>>, %arg5: memref<2x8x32xf32, #tpu.memory_space<vmem>>) attributes {dimension_semantics = [], scalar_prefetch = 0 : i64, scratch_operands = 0 : i64, tpu.core_type = #tpu.core_type<tc>} {
    %c0 = arith.constant 0 : index
    %c0_0 = arith.constant 0 : index
    %c0_1 = arith.constant 0 : index
    %0 = vector.load %arg0[%c0, %c0_0, %c0_1] : memref<2x8x32xf32, #tpu.memory_space<vmem>>, vector<2x8x32xf32>
    %1 = vector.shape_cast %0 : vector<2x8x32xf32> to vector<16x32xf32>
    %c0_2 = arith.constant 0 : index
    %c0_3 = arith.constant 0 : index
    %c0_4 = arith.constant 0 : index
    %2 = vector.load %arg1[%c0_2, %c0_3, %c0_4] : memref<2x16x32xf32, #tpu.memory_space<vmem>>, vector<2x16x32xf32>
    %3 = vector.shape_cast %2 : vector<2x16x32xf32> to vector<32x32xf32>
    %c0_5 = arith.constant 0 : index
    %c128 = arith.constant 128 : index
    %4 = vector.load %arg2[%c0_5, %c128] : memref<32x384xf32, #tpu.memory_space<vmem>>, vector<32x96xf32>
    %cst = arith.constant dense<0.000000e+00> : vector<16x96xf32>
    %5 = tpu.matmul %1, %4, %cst {dimension_numbers = #tpu.dot_dimension_numbers<[1], [0], [0], [1], [0, 0, 1, 1], [], []>} : vector<16x32xf32>, vector<32x96xf32>, vector<16x96xf32> -> vector<16x96xf32>
    %c1 = arith.constant 1 : index
    %c0_6 = arith.constant 0 : index
    %6 = vector.load %arg4[%c1, %c0_6] : memref<16x128xf32, #tpu.memory_space<vmem>>, vector<1x96xf32>
    %7 = vector.broadcast %6 : vector<1x96xf32> to vector<16x96xf32>
    %8 = arith.addf %5, %7 : vector<16x96xf32>
    %9 = vector.extract_strided_slice %8 {offsets = [0, 0], sizes = [16, 32], strides = [1, 1]} : vector<16x96xf32> to vector<16x32xf32>
    %cst_7 = arith.constant 0.353553385 : f32
    %10 = vector.broadcast %cst_7 : f32 to vector<16x32xf32>
    %11 = arith.mulf %9, %10 : vector<16x32xf32>
    %12 = vector.extract_strided_slice %8 {offsets = [0, 32], sizes = [16, 32], strides = [1, 1]} : vector<16x96xf32> to vector<16x32xf32>
    %13 = vector.extract_strided_slice %8 {offsets = [0, 64], sizes = [16, 32], strides = [1, 1]} : vector<16x96xf32> to vector<16x32xf32>
    %14 = vector.shape_cast %11 : vector<16x32xf32> to vector<2x8x32xf32>
    %15 = vector.shape_cast %12 : vector<16x32xf32> to vector<2x8x32xf32>
    %16 = vector.shape_cast %13 : vector<16x32xf32> to vector<2x8x32xf32>
    %17 = vector.extract_strided_slice %14 {offsets = [0, 0, 0], sizes = [2, 8, 8], strides = [1, 1, 1]} : vector<2x8x32xf32> to vector<2x8x8xf32>
    %18 = vector.extract_strided_slice %15 {offsets = [0, 0, 0], sizes = [2, 8, 8], strides = [1, 1, 1]} : vector<2x8x32xf32> to vector<2x8x8xf32>
    "tpu.trace_start"() <{level = 10 : i32, message = "bqe,bke->bqk"}> : () -> ()
    %cst_8 = arith.constant dense<0.000000e+00> : vector<2x8x8xf32>
    %19 = tpu.matmul %17, %18, %cst_8 {dimension_numbers = #tpu.dot_dimension_numbers<[2], [2], [1], [1], [0, 0, 0, 1, 1, 1], [0], [0]>} : vector<2x8x8xf32>, vector<2x8x8xf32>, vector<2x8x8xf32> -> vector<2x8x8xf32>
    "tpu.trace_stop"() : () -> ()
    %cst_9 = arith.constant dense<0xFF800000> : vector<2x8xf32>
    %20 = vector.multi_reduction <maximumf>, %19, %cst_9 [2] : vector<2x8x8xf32> to vector<2x8xf32>
    %21 = vector.shape_cast %20 : vector<2x8xf32> to vector<2x8x1xf32>
    %22 = vector.broadcast %21 : vector<2x8x1xf32> to vector<2x8x8xf32>
    %23 = arith.subf %19, %22 : vector<2x8x8xf32>
    %24 = math.exp %23 : vector<2x8x8xf32>
    %cst_10 = arith.constant dense<0.000000e+00> : vector<2x8xf32>
    %25 = vector.multi_reduction <add>, %24, %cst_10 [2] : vector<2x8x8xf32> to vector<2x8xf32>
    %26 = vector.shape_cast %25 : vector<2x8xf32> to vector<2x8x1xf32>
    %27 = vector.broadcast %26 : vector<2x8x1xf32> to vector<2x8x8xf32>
    %28 = arith.divf %24, %27 : vector<2x8x8xf32>
    %29 = vector.extract_strided_slice %16 {offsets = [0, 0, 0], sizes = [2, 8, 8], strides = [1, 1, 1]} : vector<2x8x32xf32> to vector<2x8x8xf32>
    "tpu.trace_start"() <{level = 10 : i32, message = "bqk,bke->bqe"}> : () -> ()
    %cst_11 = arith.constant dense<0.000000e+00> : vector<2x8x8xf32>
    %30 = tpu.matmul %28, %29, %cst_11 {dimension_numbers = #tpu.dot_dimension_numbers<[2], [1], [1], [2], [0, 0, 0, 1, 1, 2], [0], [0]>} : vector<2x8x8xf32>, vector<2x8x8xf32>, vector<2x8x8xf32> -> vector<2x8x8xf32>
    "tpu.trace_stop"() : () -> ()
    %31 = vector.extract_strided_slice %14 {offsets = [0, 0, 8], sizes = [2, 8, 8], strides = [1, 1, 1]} : vector<2x8x32xf32> to vector<2x8x8xf32>
    %32 = vector.extract_strided_slice %15 {offsets = [0, 0, 8], sizes = [2, 8, 8], strides = [1, 1, 1]} : vector<2x8x32xf32> to vector<2x8x8xf32>
    "tpu.trace_start"() <{level = 10 : i32, message = "bqe,bke->bqk"}> : () -> ()
    %cst_12 = arith.constant dense<0.000000e+00> : vector<2x8x8xf32>
    %33 = tpu.matmul %31, %32, %cst_12 {dimension_numbers = #tpu.dot_dimension_numbers<[2], [2], [1], [1], [0, 0, 0, 1, 1, 1], [0], [0]>} : vector<2x8x8xf32>, vector<2x8x8xf32>, vector<2x8x8xf32> -> vector<2x8x8xf32>
    "tpu.trace_stop"() : () -> ()
    %cst_13 = arith.constant dense<0xFF800000> : vector<2x8xf32>
    %34 = vector.multi_reduction <maximumf>, %33, %cst_13 [2] : vector<2x8x8xf32> to vector<2x8xf32>
    %35 = vector.shape_cast %34 : vector<2x8xf32> to vector<2x8x1xf32>
    %36 = vector.broadcast %35 : vector<2x8x1xf32> to vector<2x8x8xf32>
    %37 = arith.subf %33, %36 : vector<2x8x8xf32>
    %38 = math.exp %37 : vector<2x8x8xf32>
    %cst_14 = arith.constant dense<0.000000e+00> : vector<2x8xf32>
    %39 = vector.multi_reduction <add>, %38, %cst_14 [2] : vector<2x8x8xf32> to vector<2x8xf32>
    %40 = vector.shape_cast %39 : vector<2x8xf32> to vector<2x8x1xf32>
    %41 = vector.broadcast %40 : vector<2x8x1xf32> to vector<2x8x8xf32>
    %42 = arith.divf %38, %41 : vector<2x8x8xf32>
    %43 = vector.extract_strided_slice %16 {offsets = [0, 0, 8], sizes = [2, 8, 8], strides = [1, 1, 1]} : vector<2x8x32xf32> to vector<2x8x8xf32>
    "tpu.trace_start"() <{level = 10 : i32, message = "bqk,bke->bqe"}> : () -> ()
    %cst_15 = arith.constant dense<0.000000e+00> : vector<2x8x8xf32>
    %44 = tpu.matmul %42, %43, %cst_15 {dimension_numbers = #tpu.dot_dimension_numbers<[2], [1], [1], [2], [0, 0, 0, 1, 1, 2], [0], [0]>} : vector<2x8x8xf32>, vector<2x8x8xf32>, vector<2x8x8xf32> -> vector<2x8x8xf32>
    "tpu.trace_stop"() : () -> ()
    %45 = vector.extract_strided_slice %14 {offsets = [0, 0, 16], sizes = [2, 8, 8], strides = [1, 1, 1]} : vector<2x8x32xf32> to vector<2x8x8xf32>
    %46 = vector.extract_strided_slice %15 {offsets = [0, 0, 16], sizes = [2, 8, 8], strides = [1, 1, 1]} : vector<2x8x32xf32> to vector<2x8x8xf32>
    "tpu.trace_start"() <{level = 10 : i32, message = "bqe,bke->bqk"}> : () -> ()
    %cst_16 = arith.constant dense<0.000000e+00> : vector<2x8x8xf32>
    %47 = tpu.matmul %45, %46, %cst_16 {dimension_numbers = #tpu.dot_dimension_numbers<[2], [2], [1], [1], [0, 0, 0, 1, 1, 1], [0], [0]>} : vector<2x8x8xf32>, vector<2x8x8xf32>, vector<2x8x8xf32> -> vector<2x8x8xf32>
    "tpu.trace_stop"() : () -> ()
    %cst_17 = arith.constant dense<0xFF800000> : vector<2x8xf32>
    %48 = vector.multi_reduction <maximumf>, %47, %cst_17 [2] : vector<2x8x8xf32> to vector<2x8xf32>
    %49 = vector.shape_cast %48 : vector<2x8xf32> to vector<2x8x1xf32>
    %50 = vector.broadcast %49 : vector<2x8x1xf32> to vector<2x8x8xf32>
    %51 = arith.subf %47, %50 : vector<2x8x8xf32>
    %52 = math.exp %51 : vector<2x8x8xf32>
    %cst_18 = arith.constant dense<0.000000e+00> : vector<2x8xf32>
    %53 = vector.multi_reduction <add>, %52, %cst_18 [2] : vector<2x8x8xf32> to vector<2x8xf32>
    %54 = vector.shape_cast %53 : vector<2x8xf32> to vector<2x8x1xf32>
    %55 = vector.broadcast %54 : vector<2x8x1xf32> to vector<2x8x8xf32>
    %56 = arith.divf %52, %55 : vector<2x8x8xf32>
    %57 = vector.extract_strided_slice %16 {offsets = [0, 0, 16], sizes = [2, 8, 8], strides = [1, 1, 1]} : vector<2x8x32xf32> to vector<2x8x8xf32>
    "tpu.trace_start"() <{level = 10 : i32, message = "bqk,bke->bqe"}> : () -> ()
    %cst_19 = arith.constant dense<0.000000e+00> : vector<2x8x8xf32>
    %58 = tpu.matmul %56, %57, %cst_19 {dimension_numbers = #tpu.dot_dimension_numbers<[2], [1], [1], [2], [0, 0, 0, 1, 1, 2], [0], [0]>} : vector<2x8x8xf32>, vector<2x8x8xf32>, vector<2x8x8xf32> -> vector<2x8x8xf32>
    "tpu.trace_stop"() : () -> ()
    %59 = vector.extract_strided_slice %14 {offsets = [0, 0, 24], sizes = [2, 8, 8], strides = [1, 1, 1]} : vector<2x8x32xf32> to vector<2x8x8xf32>
    %60 = vector.extract_strided_slice %15 {offsets = [0, 0, 24], sizes = [2, 8, 8], strides = [1, 1, 1]} : vector<2x8x32xf32> to vector<2x8x8xf32>
    "tpu.trace_start"() <{level = 10 : i32, message = "bqe,bke->bqk"}> : () -> ()
    %cst_20 = arith.constant dense<0.000000e+00> : vector<2x8x8xf32>
    %61 = tpu.matmul %59, %60, %cst_20 {dimension_numbers = #tpu.dot_dimension_numbers<[2], [2], [1], [1], [0, 0, 0, 1, 1, 1], [0], [0]>} : vector<2x8x8xf32>, vector<2x8x8xf32>, vector<2x8x8xf32> -> vector<2x8x8xf32>
    "tpu.trace_stop"() : () -> ()
    %cst_21 = arith.constant dense<0xFF800000> : vector<2x8xf32>
    %62 = vector.multi_reduction <maximumf>, %61, %cst_21 [2] : vector<2x8x8xf32> to vector<2x8xf32>
    %63 = vector.shape_cast %62 : vector<2x8xf32> to vector<2x8x1xf32>
    %64 = vector.broadcast %63 : vector<2x8x1xf32> to vector<2x8x8xf32>
    %65 = arith.subf %61, %64 : vector<2x8x8xf32>
    %66 = math.exp %65 : vector<2x8x8xf32>
    %cst_22 = arith.constant dense<0.000000e+00> : vector<2x8xf32>
    %67 = vector.multi_reduction <add>, %66, %cst_22 [2] : vector<2x8x8xf32> to vector<2x8xf32>
    %68 = vector.shape_cast %67 : vector<2x8xf32> to vector<2x8x1xf32>
    %69 = vector.broadcast %68 : vector<2x8x1xf32> to vector<2x8x8xf32>
    %70 = arith.divf %66, %69 : vector<2x8x8xf32>
    %71 = vector.extract_strided_slice %16 {offsets = [0, 0, 24], sizes = [2, 8, 8], strides = [1, 1, 1]} : vector<2x8x32xf32> to vector<2x8x8xf32>
    "tpu.trace_start"() <{level = 10 : i32, message = "bqk,bke->bqe"}> : () -> ()
    %cst_23 = arith.constant dense<0.000000e+00> : vector<2x8x8xf32>
    %72 = tpu.matmul %70, %71, %cst_23 {dimension_numbers = #tpu.dot_dimension_numbers<[2], [1], [1], [2], [0, 0, 0, 1, 1, 2], [0], [0]>} : vector<2x8x8xf32>, vector<2x8x8xf32>, vector<2x8x8xf32> -> vector<2x8x8xf32>
    "tpu.trace_stop"() : () -> ()
    %73 = tpu.concatenate %30, %44, %58, %72 in 2 : vector<2x8x8xf32>, vector<2x8x8xf32>, vector<2x8x8xf32>, vector<2x8x8xf32> -> vector<2x8x32xf32>
    %74 = vector.shape_cast %73 : vector<2x8x32xf32> to vector<16x32xf32>
    %c0_24 = arith.constant 0 : index
    %c224 = arith.constant 224 : index
    %75 = vector.load %arg2[%c0_24, %c224] : memref<32x384xf32, #tpu.memory_space<vmem>>, vector<32x32xf32>
    %cst_25 = arith.constant dense<0.000000e+00> : vector<16x32xf32>
    %76 = tpu.matmul %74, %75, %cst_25 {dimension_numbers = #tpu.dot_dimension_numbers<[1], [0], [0], [1], [0, 0, 1, 1], [], []>} : vector<16x32xf32>, vector<32x32xf32>, vector<16x32xf32> -> vector<16x32xf32>
    %c2 = arith.constant 2 : index
    %c0_26 = arith.constant 0 : index
    %77 = vector.load %arg4[%c2, %c0_26] : memref<16x128xf32, #tpu.memory_space<vmem>>, vector<1x32xf32>
    %78 = vector.broadcast %77 : vector<1x32xf32> to vector<16x32xf32>
    %79 = arith.addf %76, %78 : vector<16x32xf32>
    %80 = arith.addf %1, %79 : vector<16x32xf32>
    %c7 = arith.constant 7 : index
    %c0_27 = arith.constant 0 : index
    %81 = vector.load %arg4[%c7, %c0_27] : memref<16x128xf32, #tpu.memory_space<vmem>>, vector<1x32xf32>
    %c8 = arith.constant 8 : index
    %c0_28 = arith.constant 0 : index
    %82 = vector.load %arg4[%c8, %c0_28] : memref<16x128xf32, #tpu.memory_space<vmem>>, vector<1x32xf32>
    %cst_29 = arith.constant dense<0.000000e+00> : vector<16xf32>
    %83 = vector.multi_reduction <add>, %80, %cst_29 [1] : vector<16x32xf32> to vector<16xf32>
    %84 = vector.shape_cast %83 : vector<16xf32> to vector<16x1xf32>
    %cst_30 = arith.constant 3.200000e+01 : f32
    %85 = vector.broadcast %cst_30 : f32 to vector<16x1xf32>
    %86 = arith.divf %84, %85 : vector<16x1xf32>
    %87 = vector.broadcast %86 : vector<16x1xf32> to vector<16x32xf32>
    %88 = arith.subf %80, %87 : vector<16x32xf32>
    %89 = arith.mulf %88, %88 : vector<16x32xf32>
    %cst_31 = arith.constant dense<0.000000e+00> : vector<16xf32>
    %90 = vector.multi_reduction <add>, %89, %cst_31 [1] : vector<16x32xf32> to vector<16xf32>
    %91 = vector.shape_cast %90 : vector<16xf32> to vector<16x1xf32>
    %cst_32 = arith.constant 3.200000e+01 : f32
    %92 = vector.broadcast %cst_32 : f32 to vector<16x1xf32>
    %93 = arith.divf %91, %92 : vector<16x1xf32>
    %94 = vector.broadcast %86 : vector<16x1xf32> to vector<16x32xf32>
    %95 = arith.subf %80, %94 : vector<16x32xf32>
    %cst_33 = arith.constant 9.99999974E-6 : f32
    %96 = vector.broadcast %cst_33 : f32 to vector<16x1xf32>
    %97 = arith.addf %93, %96 : vector<16x1xf32>
    %98 = math.rsqrt %97 : vector<16x1xf32>
    %99 = vector.broadcast %98 : vector<16x1xf32> to vector<16x32xf32>
    %100 = arith.mulf %95, %99 : vector<16x32xf32>
    %101 = vector.broadcast %81 : vector<1x32xf32> to vector<16x32xf32>
    %102 = arith.mulf %100, %101 : vector<16x32xf32>
    %103 = vector.broadcast %82 : vector<1x32xf32> to vector<16x32xf32>
    %104 = arith.addf %102, %103 : vector<16x32xf32>
    %c9 = arith.constant 9 : index
    %c0_34 = arith.constant 0 : index
    %105 = vector.load %arg4[%c9, %c0_34] : memref<16x128xf32, #tpu.memory_space<vmem>>, vector<1x32xf32>
    %c10 = arith.constant 10 : index
    %c0_35 = arith.constant 0 : index
    %106 = vector.load %arg4[%c10, %c0_35] : memref<16x128xf32, #tpu.memory_space<vmem>>, vector<1x32xf32>
    %cst_36 = arith.constant dense<0.000000e+00> : vector<16xf32>
    %107 = vector.multi_reduction <add>, %104, %cst_36 [1] : vector<16x32xf32> to vector<16xf32>
    %108 = vector.shape_cast %107 : vector<16xf32> to vector<16x1xf32>
    %cst_37 = arith.constant 3.200000e+01 : f32
    %109 = vector.broadcast %cst_37 : f32 to vector<16x1xf32>
    %110 = arith.divf %108, %109 : vector<16x1xf32>
    %111 = vector.broadcast %110 : vector<16x1xf32> to vector<16x32xf32>
    %112 = arith.subf %104, %111 : vector<16x32xf32>
    %113 = arith.mulf %112, %112 : vector<16x32xf32>
    %cst_38 = arith.constant dense<0.000000e+00> : vector<16xf32>
    %114 = vector.multi_reduction <add>, %113, %cst_38 [1] : vector<16x32xf32> to vector<16xf32>
    %115 = vector.shape_cast %114 : vector<16xf32> to vector<16x1xf32>
    %cst_39 = arith.constant 3.200000e+01 : f32
    %116 = vector.broadcast %cst_39 : f32 to vector<16x1xf32>
    %117 = arith.divf %115, %116 : vector<16x1xf32>
    %118 = vector.broadcast %110 : vector<16x1xf32> to vector<16x32xf32>
    %119 = arith.subf %104, %118 : vector<16x32xf32>
    %cst_40 = arith.constant 9.99999974E-6 : f32
    %120 = vector.broadcast %cst_40 : f32 to vector<16x1xf32>
    %121 = arith.addf %117, %120 : vector<16x1xf32>
    %122 = math.rsqrt %121 : vector<16x1xf32>
    %123 = vector.broadcast %122 : vector<16x1xf32> to vector<16x32xf32>
    %124 = arith.mulf %119, %123 : vector<16x32xf32>
    %125 = vector.broadcast %105 : vector<1x32xf32> to vector<16x32xf32>
    %126 = arith.mulf %124, %125 : vector<16x32xf32>
    %127 = vector.broadcast %106 : vector<1x32xf32> to vector<16x32xf32>
    %128 = arith.addf %126, %127 : vector<16x32xf32>
    %c0_41 = arith.constant 0 : index
    %c256 = arith.constant 256 : index
    %129 = vector.load %arg2[%c0_41, %c256] : memref<32x384xf32, #tpu.memory_space<vmem>>, vector<32x32xf32>
    %cst_42 = arith.constant dense<0.000000e+00> : vector<16x32xf32>
    %130 = tpu.matmul %128, %129, %cst_42 {dimension_numbers = #tpu.dot_dimension_numbers<[1], [0], [0], [1], [0, 0, 1, 1], [], []>} : vector<16x32xf32>, vector<32x32xf32>, vector<16x32xf32> -> vector<16x32xf32>
    %c3 = arith.constant 3 : index
    %c0_43 = arith.constant 0 : index
    %131 = vector.load %arg4[%c3, %c0_43] : memref<16x128xf32, #tpu.memory_space<vmem>>, vector<1x32xf32>
    %132 = vector.broadcast %131 : vector<1x32xf32> to vector<16x32xf32>
    %133 = arith.addf %130, %132 : vector<16x32xf32>
    %c0_44 = arith.constant 0 : index
    %c288 = arith.constant 288 : index
    %134 = vector.load %arg2[%c0_44, %c288] : memref<32x384xf32, #tpu.memory_space<vmem>>, vector<32x64xf32>
    %cst_45 = arith.constant dense<0.000000e+00> : vector<32x64xf32>
    %135 = tpu.matmul %3, %134, %cst_45 {dimension_numbers = #tpu.dot_dimension_numbers<[1], [0], [0], [1], [0, 0, 1, 1], [], []>} : vector<32x32xf32>, vector<32x64xf32>, vector<32x64xf32> -> vector<32x64xf32>
    %c4 = arith.constant 4 : index
    %c0_46 = arith.constant 0 : index
    %136 = vector.load %arg4[%c4, %c0_46] : memref<16x128xf32, #tpu.memory_space<vmem>>, vector<1x64xf32>
    %137 = vector.broadcast %136 : vector<1x64xf32> to vector<32x64xf32>
    %138 = arith.addf %135, %137 : vector<32x64xf32>
    %cst_47 = arith.constant 0.353553385 : f32
    %139 = vector.broadcast %cst_47 : f32 to vector<16x32xf32>
    %140 = arith.mulf %133, %139 : vector<16x32xf32>
    %141 = vector.extract_strided_slice %138 {offsets = [0, 0], sizes = [32, 32], strides = [1, 1]} : vector<32x64xf32> to vector<32x32xf32>
    %142 = vector.extract_strided_slice %138 {offsets = [0, 32], sizes = [32, 32], strides = [1, 1]} : vector<32x64xf32> to vector<32x32xf32>
    %143 = vector.shape_cast %140 : vector<16x32xf32> to vector<2x8x32xf32>
    %144 = vector.shape_cast %141 : vector<32x32xf32> to vector<2x16x32xf32>
    %145 = vector.shape_cast %142 : vector<32x32xf32> to vector<2x16x32xf32>
    %146 = vector.extract_strided_slice %143 {offsets = [0, 0, 0], sizes = [2, 8, 8], strides = [1, 1, 1]} : vector<2x8x32xf32> to vector<2x8x8xf32>
    %147 = vector.extract_strided_slice %144 {offsets = [0, 0, 0], sizes = [2, 16, 8], strides = [1, 1, 1]} : vector<2x16x32xf32> to vector<2x16x8xf32>
    "tpu.trace_start"() <{level = 10 : i32, message = "bqe,bke->bqk"}> : () -> ()
    %cst_48 = arith.constant dense<0.000000e+00> : vector<2x8x16xf32>
    %148 = tpu.matmul %146, %147, %cst_48 {dimension_numbers = #tpu.dot_dimension_numbers<[2], [2], [1], [1], [0, 0, 0, 1, 1, 1], [0], [0]>} : vector<2x8x8xf32>, vector<2x16x8xf32>, vector<2x8x16xf32> -> vector<2x8x16xf32>
    "tpu.trace_stop"() : () -> ()
    %cst_49 = arith.constant dense<0xFF800000> : vector<2x8xf32>
    %149 = vector.multi_reduction <maximumf>, %148, %cst_49 [2] : vector<2x8x16xf32> to vector<2x8xf32>
    %150 = vector.shape_cast %149 : vector<2x8xf32> to vector<2x8x1xf32>
    %151 = vector.broadcast %150 : vector<2x8x1xf32> to vector<2x8x16xf32>
    %152 = arith.subf %148, %151 : vector<2x8x16xf32>
    %153 = math.exp %152 : vector<2x8x16xf32>
    %cst_50 = arith.constant dense<0.000000e+00> : vector<2x8xf32>
    %154 = vector.multi_reduction <add>, %153, %cst_50 [2] : vector<2x8x16xf32> to vector<2x8xf32>
    %155 = vector.shape_cast %154 : vector<2x8xf32> to vector<2x8x1xf32>
    %156 = vector.broadcast %155 : vector<2x8x1xf32> to vector<2x8x16xf32>
    %157 = arith.divf %153, %156 : vector<2x8x16xf32>
    %158 = vector.extract_strided_slice %145 {offsets = [0, 0, 0], sizes = [2, 16, 8], strides = [1, 1, 1]} : vector<2x16x32xf32> to vector<2x16x8xf32>
    "tpu.trace_start"() <{level = 10 : i32, message = "bqk,bke->bqe"}> : () -> ()
    %cst_51 = arith.constant dense<0.000000e+00> : vector<2x8x8xf32>
    %159 = tpu.matmul %157, %158, %cst_51 {dimension_numbers = #tpu.dot_dimension_numbers<[2], [1], [1], [2], [0, 0, 0, 1, 1, 2], [0], [0]>} : vector<2x8x16xf32>, vector<2x16x8xf32>, vector<2x8x8xf32> -> vector<2x8x8xf32>
    "tpu.trace_stop"() : () -> ()
    %160 = vector.extract_strided_slice %143 {offsets = [0, 0, 8], sizes = [2, 8, 8], strides = [1, 1, 1]} : vector<2x8x32xf32> to vector<2x8x8xf32>
    %161 = vector.extract_strided_slice %144 {offsets = [0, 0, 8], sizes = [2, 16, 8], strides = [1, 1, 1]} : vector<2x16x32xf32> to vector<2x16x8xf32>
    "tpu.trace_start"() <{level = 10 : i32, message = "bqe,bke->bqk"}> : () -> ()
    %cst_52 = arith.constant dense<0.000000e+00> : vector<2x8x16xf32>
    %162 = tpu.matmul %160, %161, %cst_52 {dimension_numbers = #tpu.dot_dimension_numbers<[2], [2], [1], [1], [0, 0, 0, 1, 1, 1], [0], [0]>} : vector<2x8x8xf32>, vector<2x16x8xf32>, vector<2x8x16xf32> -> vector<2x8x16xf32>
    "tpu.trace_stop"() : () -> ()
    %cst_53 = arith.constant dense<0xFF800000> : vector<2x8xf32>
    %163 = vector.multi_reduction <maximumf>, %162, %cst_53 [2] : vector<2x8x16xf32> to vector<2x8xf32>
    %164 = vector.shape_cast %163 : vector<2x8xf32> to vector<2x8x1xf32>
    %165 = vector.broadcast %164 : vector<2x8x1xf32> to vector<2x8x16xf32>
    %166 = arith.subf %162, %165 : vector<2x8x16xf32>
    %167 = math.exp %166 : vector<2x8x16xf32>
    %cst_54 = arith.constant dense<0.000000e+00> : vector<2x8xf32>
    %168 = vector.multi_reduction <add>, %167, %cst_54 [2] : vector<2x8x16xf32> to vector<2x8xf32>
    %169 = vector.shape_cast %168 : vector<2x8xf32> to vector<2x8x1xf32>
    %170 = vector.broadcast %169 : vector<2x8x1xf32> to vector<2x8x16xf32>
    %171 = arith.divf %167, %170 : vector<2x8x16xf32>
    %172 = vector.extract_strided_slice %145 {offsets = [0, 0, 8], sizes = [2, 16, 8], strides = [1, 1, 1]} : vector<2x16x32xf32> to vector<2x16x8xf32>
    "tpu.trace_start"() <{level = 10 : i32, message = "bqk,bke->bqe"}> : () -> ()
    %cst_55 = arith.constant dense<0.000000e+00> : vector<2x8x8xf32>
    %173 = tpu.matmul %171, %172, %cst_55 {dimension_numbers = #tpu.dot_dimension_numbers<[2], [1], [1], [2], [0, 0, 0, 1, 1, 2], [0], [0]>} : vector<2x8x16xf32>, vector<2x16x8xf32>, vector<2x8x8xf32> -> vector<2x8x8xf32>
    "tpu.trace_stop"() : () -> ()
    %174 = vector.extract_strided_slice %143 {offsets = [0, 0, 16], sizes = [2, 8, 8], strides = [1, 1, 1]} : vector<2x8x32xf32> to vector<2x8x8xf32>
    %175 = vector.extract_strided_slice %144 {offsets = [0, 0, 16], sizes = [2, 16, 8], strides = [1, 1, 1]} : vector<2x16x32xf32> to vector<2x16x8xf32>
    "tpu.trace_start"() <{level = 10 : i32, message = "bqe,bke->bqk"}> : () -> ()
    %cst_56 = arith.constant dense<0.000000e+00> : vector<2x8x16xf32>
    %176 = tpu.matmul %174, %175, %cst_56 {dimension_numbers = #tpu.dot_dimension_numbers<[2], [2], [1], [1], [0, 0, 0, 1, 1, 1], [0], [0]>} : vector<2x8x8xf32>, vector<2x16x8xf32>, vector<2x8x16xf32> -> vector<2x8x16xf32>
    "tpu.trace_stop"() : () -> ()
    %cst_57 = arith.constant dense<0xFF800000> : vector<2x8xf32>
    %177 = vector.multi_reduction <maximumf>, %176, %cst_57 [2] : vector<2x8x16xf32> to vector<2x8xf32>
    %178 = vector.shape_cast %177 : vector<2x8xf32> to vector<2x8x1xf32>
    %179 = vector.broadcast %178 : vector<2x8x1xf32> to vector<2x8x16xf32>
    %180 = arith.subf %176, %179 : vector<2x8x16xf32>
    %181 = math.exp %180 : vector<2x8x16xf32>
    %cst_58 = arith.constant dense<0.000000e+00> : vector<2x8xf32>
    %182 = vector.multi_reduction <add>, %181, %cst_58 [2] : vector<2x8x16xf32> to vector<2x8xf32>
    %183 = vector.shape_cast %182 : vector<2x8xf32> to vector<2x8x1xf32>
    %184 = vector.broadcast %183 : vector<2x8x1xf32> to vector<2x8x16xf32>
    %185 = arith.divf %181, %184 : vector<2x8x16xf32>
    %186 = vector.extract_strided_slice %145 {offsets = [0, 0, 16], sizes = [2, 16, 8], strides = [1, 1, 1]} : vector<2x16x32xf32> to vector<2x16x8xf32>
    "tpu.trace_start"() <{level = 10 : i32, message = "bqk,bke->bqe"}> : () -> ()
    %cst_59 = arith.constant dense<0.000000e+00> : vector<2x8x8xf32>
    %187 = tpu.matmul %185, %186, %cst_59 {dimension_numbers = #tpu.dot_dimension_numbers<[2], [1], [1], [2], [0, 0, 0, 1, 1, 2], [0], [0]>} : vector<2x8x16xf32>, vector<2x16x8xf32>, vector<2x8x8xf32> -> vector<2x8x8xf32>
    "tpu.trace_stop"() : () -> ()
    %188 = vector.extract_strided_slice %143 {offsets = [0, 0, 24], sizes = [2, 8, 8], strides = [1, 1, 1]} : vector<2x8x32xf32> to vector<2x8x8xf32>
    %189 = vector.extract_strided_slice %144 {offsets = [0, 0, 24], sizes = [2, 16, 8], strides = [1, 1, 1]} : vector<2x16x32xf32> to vector<2x16x8xf32>
    "tpu.trace_start"() <{level = 10 : i32, message = "bqe,bke->bqk"}> : () -> ()
    %cst_60 = arith.constant dense<0.000000e+00> : vector<2x8x16xf32>
    %190 = tpu.matmul %188, %189, %cst_60 {dimension_numbers = #tpu.dot_dimension_numbers<[2], [2], [1], [1], [0, 0, 0, 1, 1, 1], [0], [0]>} : vector<2x8x8xf32>, vector<2x16x8xf32>, vector<2x8x16xf32> -> vector<2x8x16xf32>
    "tpu.trace_stop"() : () -> ()
    %cst_61 = arith.constant dense<0xFF800000> : vector<2x8xf32>
    %191 = vector.multi_reduction <maximumf>, %190, %cst_61 [2] : vector<2x8x16xf32> to vector<2x8xf32>
    %192 = vector.shape_cast %191 : vector<2x8xf32> to vector<2x8x1xf32>
    %193 = vector.broadcast %192 : vector<2x8x1xf32> to vector<2x8x16xf32>
    %194 = arith.subf %190, %193 : vector<2x8x16xf32>
    %195 = math.exp %194 : vector<2x8x16xf32>
    %cst_62 = arith.constant dense<0.000000e+00> : vector<2x8xf32>
    %196 = vector.multi_reduction <add>, %195, %cst_62 [2] : vector<2x8x16xf32> to vector<2x8xf32>
    %197 = vector.shape_cast %196 : vector<2x8xf32> to vector<2x8x1xf32>
    %198 = vector.broadcast %197 : vector<2x8x1xf32> to vector<2x8x16xf32>
    %199 = arith.divf %195, %198 : vector<2x8x16xf32>
    %200 = vector.extract_strided_slice %145 {offsets = [0, 0, 24], sizes = [2, 16, 8], strides = [1, 1, 1]} : vector<2x16x32xf32> to vector<2x16x8xf32>
    "tpu.trace_start"() <{level = 10 : i32, message = "bqk,bke->bqe"}> : () -> ()
    %cst_63 = arith.constant dense<0.000000e+00> : vector<2x8x8xf32>
    %201 = tpu.matmul %199, %200, %cst_63 {dimension_numbers = #tpu.dot_dimension_numbers<[2], [1], [1], [2], [0, 0, 0, 1, 1, 2], [0], [0]>} : vector<2x8x16xf32>, vector<2x16x8xf32>, vector<2x8x8xf32> -> vector<2x8x8xf32>
    "tpu.trace_stop"() : () -> ()
    %202 = tpu.concatenate %159, %173, %187, %201 in 2 : vector<2x8x8xf32>, vector<2x8x8xf32>, vector<2x8x8xf32>, vector<2x8x8xf32> -> vector<2x8x32xf32>
    %203 = vector.shape_cast %202 : vector<2x8x32xf32> to vector<16x32xf32>
    %c0_64 = arith.constant 0 : index
    %c352 = arith.constant 352 : index
    %204 = vector.load %arg2[%c0_64, %c352] : memref<32x384xf32, #tpu.memory_space<vmem>>, vector<32x32xf32>
    %cst_65 = arith.constant dense<0.000000e+00> : vector<16x32xf32>
    %205 = tpu.matmul %203, %204, %cst_65 {dimension_numbers = #tpu.dot_dimension_numbers<[1], [0], [0], [1], [0, 0, 1, 1], [], []>} : vector<16x32xf32>, vector<32x32xf32>, vector<16x32xf32> -> vector<16x32xf32>
    %c5 = arith.constant 5 : index
    %c0_66 = arith.constant 0 : index
    %206 = vector.load %arg4[%c5, %c0_66] : memref<16x128xf32, #tpu.memory_space<vmem>>, vector<1x32xf32>
    %207 = vector.broadcast %206 : vector<1x32xf32> to vector<16x32xf32>
    %208 = arith.addf %205, %207 : vector<16x32xf32>
    %209 = arith.addf %104, %208 : vector<16x32xf32>
    %cst_67 = arith.constant dense<0.000000e+00> : vector<16xf32>
    %210 = vector.multi_reduction <add>, %209, %cst_67 [1] : vector<16x32xf32> to vector<16xf32>
    %211 = vector.shape_cast %210 : vector<16xf32> to vector<16x1xf32>
    %cst_68 = arith.constant 3.200000e+01 : f32
    %212 = vector.broadcast %cst_68 : f32 to vector<16x1xf32>
    %213 = arith.divf %211, %212 : vector<16x1xf32>
    %214 = vector.broadcast %213 : vector<16x1xf32> to vector<16x32xf32>
    %215 = arith.subf %209, %214 : vector<16x32xf32>
    %216 = arith.mulf %215, %215 : vector<16x32xf32>
    %cst_69 = arith.constant dense<0.000000e+00> : vector<16xf32>
    %217 = vector.multi_reduction <add>, %216, %cst_69 [1] : vector<16x32xf32> to vector<16xf32>
    %218 = vector.shape_cast %217 : vector<16xf32> to vector<16x1xf32>
    %cst_70 = arith.constant 3.200000e+01 : f32
    %219 = vector.broadcast %cst_70 : f32 to vector<16x1xf32>
    %220 = arith.divf %218, %219 : vector<16x1xf32>
    %221 = vector.broadcast %213 : vector<16x1xf32> to vector<16x32xf32>
    %222 = arith.subf %209, %221 : vector<16x32xf32>
    %cst_71 = arith.constant 9.99999974E-6 : f32
    %223 = vector.broadcast %cst_71 : f32 to vector<16x1xf32>
    %224 = arith.addf %220, %223 : vector<16x1xf32>
    %225 = math.rsqrt %224 : vector<16x1xf32>
    %226 = vector.broadcast %225 : vector<16x1xf32> to vector<16x32xf32>
    %227 = arith.mulf %222, %226 : vector<16x32xf32>
    %228 = vector.broadcast %105 : vector<1x32xf32> to vector<16x32xf32>
    %229 = arith.mulf %227, %228 : vector<16x32xf32>
    %230 = vector.broadcast %106 : vector<1x32xf32> to vector<16x32xf32>
    %231 = arith.addf %229, %230 : vector<16x32xf32>
    %c0_72 = arith.constant 0 : index
    %c0_73 = arith.constant 0 : index
    %232 = vector.load %arg2[%c0_72, %c0_73] : memref<32x384xf32, #tpu.memory_space<vmem>>, vector<32x128xf32>
    %cst_74 = arith.constant dense<0.000000e+00> : vector<16x128xf32>
    %233 = tpu.matmul %231, %232, %cst_74 {dimension_numbers = #tpu.dot_dimension_numbers<[1], [0], [0], [1], [0, 0, 1, 1], [], []>} : vector<16x32xf32>, vector<32x128xf32>, vector<16x128xf32> -> vector<16x128xf32>
    %c0_75 = arith.constant 0 : index
    %c0_76 = arith.constant 0 : index
    %234 = vector.load %arg4[%c0_75, %c0_76] : memref<16x128xf32, #tpu.memory_space<vmem>>, vector<1x128xf32>
    %235 = vector.broadcast %234 : vector<1x128xf32> to vector<16x128xf32>
    %236 = arith.addf %233, %235 : vector<16x128xf32>
    %cst_77 = arith.constant 0.000000e+00 : f32
    %237 = vector.broadcast %cst_77 : f32 to vector<16x128xf32>
    %238 = arith.maximumf %236, %237 : vector<16x128xf32>
    %c0_78 = arith.constant 0 : index
    %c0_79 = arith.constant 0 : index
    %239 = vector.load %arg3[%c0_78, %c0_79] : memref<128x32xf32, #tpu.memory_space<vmem>>, vector<128x32xf32>
    %cst_80 = arith.constant dense<0.000000e+00> : vector<16x32xf32>
    %240 = tpu.matmul %238, %239, %cst_80 {dimension_numbers = #tpu.dot_dimension_numbers<[1], [0], [0], [1], [0, 0, 1, 1], [], []>} : vector<16x128xf32>, vector<128x32xf32>, vector<16x32xf32> -> vector<16x32xf32>
    %c6 = arith.constant 6 : index
    %c0_81 = arith.constant 0 : index
    %241 = vector.load %arg4[%c6, %c0_81] : memref<16x128xf32, #tpu.memory_space<vmem>>, vector<1x32xf32>
    %242 = vector.broadcast %241 : vector<1x32xf32> to vector<16x32xf32>
    %243 = arith.addf %240, %242 : vector<16x32xf32>
    %244 = arith.addf %231, %243 : vector<16x32xf32>
    %c11 = arith.constant 11 : index
    %c0_82 = arith.constant 0 : index
    %245 = vector.load %arg4[%c11, %c0_82] : memref<16x128xf32, #tpu.memory_space<vmem>>, vector<1x32xf32>
    %c12 = arith.constant 12 : index
    %c0_83 = arith.constant 0 : index
    %246 = vector.load %arg4[%c12, %c0_83] : memref<16x128xf32, #tpu.memory_space<vmem>>, vector<1x32xf32>
    %cst_84 = arith.constant dense<0.000000e+00> : vector<16xf32>
    %247 = vector.multi_reduction <add>, %244, %cst_84 [1] : vector<16x32xf32> to vector<16xf32>
    %248 = vector.shape_cast %247 : vector<16xf32> to vector<16x1xf32>
    %cst_85 = arith.constant 3.200000e+01 : f32
    %249 = vector.broadcast %cst_85 : f32 to vector<16x1xf32>
    %250 = arith.divf %248, %249 : vector<16x1xf32>
    %251 = vector.broadcast %250 : vector<16x1xf32> to vector<16x32xf32>
    %252 = arith.subf %244, %251 : vector<16x32xf32>
    %253 = arith.mulf %252, %252 : vector<16x32xf32>
    %cst_86 = arith.constant dense<0.000000e+00> : vector<16xf32>
    %254 = vector.multi_reduction <add>, %253, %cst_86 [1] : vector<16x32xf32> to vector<16xf32>
    %255 = vector.shape_cast %254 : vector<16xf32> to vector<16x1xf32>
    %cst_87 = arith.constant 3.200000e+01 : f32
    %256 = vector.broadcast %cst_87 : f32 to vector<16x1xf32>
    %257 = arith.divf %255, %256 : vector<16x1xf32>
    %258 = vector.broadcast %250 : vector<16x1xf32> to vector<16x32xf32>
    %259 = arith.subf %244, %258 : vector<16x32xf32>
    %cst_88 = arith.constant 9.99999974E-6 : f32
    %260 = vector.broadcast %cst_88 : f32 to vector<16x1xf32>
    %261 = arith.addf %257, %260 : vector<16x1xf32>
    %262 = math.rsqrt %261 : vector<16x1xf32>
    %263 = vector.broadcast %262 : vector<16x1xf32> to vector<16x32xf32>
    %264 = arith.mulf %259, %263 : vector<16x32xf32>
    %265 = vector.broadcast %245 : vector<1x32xf32> to vector<16x32xf32>
    %266 = arith.mulf %264, %265 : vector<16x32xf32>
    %267 = vector.broadcast %246 : vector<1x32xf32> to vector<16x32xf32>
    %268 = arith.addf %266, %267 : vector<16x32xf32>
    %269 = vector.shape_cast %268 : vector<16x32xf32> to vector<2x8x32xf32>
    %c0_89 = arith.constant 0 : index
    %c0_90 = arith.constant 0 : index
    %c0_91 = arith.constant 0 : index
    %270 = vector.load %arg5[%c0_89, %c0_90, %c0_91] : memref<2x8x32xf32, #tpu.memory_space<vmem>>, vector<2x8x32xf32>
    tpu.vector_store %arg5[%c0_89, %c0_90, %c0_91], %269 {strides = array<i32>} : memref<2x8x32xf32, #tpu.memory_space<vmem>>, vector<2x8x32xf32>,
    return
  }
}

</mosaic_0001>

<bundles_post_ra>
// kernel: transformer_decoder_layer.1
= control target key start
LH: loop header
LB: loop body
LE: loop exit
PB: predicated region body
PF: predicated region fallthrough
CT: control target
= control target key end

     0   :  { %vm36_vm0 = vcmask 261120   ;;  %s4998_s0 = inlined_call_operand.vmem [shape: f32[2,8,32], index: 0, kind: input, shape index: {}]   ;;  %s4999_s1 = inlined_call_operand.vmem [shape: f32[2,16,32], index: 1, kind: input, shape index: {}]   ;;  %s5000_s2 = inlined_call_operand.vmem [shape: f32[32,384], index: 2, kind: input, shape index: {}]   ;;  %s5001_s3 = inlined_call_operand.vmem [shape: f32[128,32], index: 3, kind: input, shape index: {}]   ;;  %s5002_s4 = inlined_call_operand.vmem [shape: f32[16,128], index: 4, kind: input, shape index: {}]   ;;  %s5003_s5 = inlined_call_operand.hbm [shape: f32[2,8,32], index: 5, kind: output, shape index: {}]  }
   0x1   :  { %v4346_v0 = vld [vmem:[%s5000_s2 + $0x50] sm:$0xff]  ;;  %v4351_v1 = vld [vmem:[%s5000_s2 + $0x38] sm:$0xff]  ;;  %v4357_v2 = vld [vmem:[%s4998_s0] sm:$0xff] }
   0x2   :  { %3877 = vmatprep.subr.mxu1 %v4346_v0  ;;  %v4363_v3 = vld [vmem:[%s5000_s2 + $0x20] sm:$0xff]  ;;  %3885 = vmatprep.mubr.msk.f32.mxu1 %vm36_vm0, %v4357_v2 }
   0x3   :  { %3878 = vmatpush3.msra.mxu1 %v4346_v0 }
   0x4   :  { %10 = vsyncpa [#allocation3], 0  ;;  %3879 = vmatprep.subr.mxu1 %v4351_v1  ;;  %v4372_v4 = vld [vmem:[%s5000_s2 + $0x8] sm:$0xff]  ;;  %v4294_v6 = vmov 0.0   ;;  %vm4295_vm1 = vmmov 0   ;;  %s4296_s6 = smov 96  }
   0x5   :  { %3880 = vmatpush3.msra.mxu1 %v4351_v1  ;;  %v4379_v5 = vld [vmem:[%s4998_s0 + $0x8] sm:$0xff]  ;;  %3898 = vmatprep.subr.mxu0 %v4294_v6  ;;  %v3658_v8 = vld [vmem:[%s5002_s4 + $0x1] ss:$0 sm:$0xff]  ;;  %vm123_vm2 = vcmask 64512   ;;  %s4297_s7 = smov 64   ;;  %s4298_s8 = smov 88  }
   0x6   :  { %3881 = vmatprep.subr.mxu1 %v4363_v3  ;;  %3900 = vmatprep.mubr.msk.f32.mxu0 %vm4295_vm1, %v4294_v6  ;;  %s4299_s9 = smov 120   ;;  %s4300_s10 = smov 56   ;;  %vm1467_vm3 = vcmask 130048   ;;  %vm1470_vm4 = vcmask 195584  }
   0x7   :  { %3882 = vmatpush3.msra.mxu1 %v4363_v3  ;;  %s4301_s11 = smov 80   ;;  %s4302_s12 = smov 112  }
   0x8   :  { %3883 = vmatprep.subr.mxu1 %v4372_v4  ;;  %s4303_s13 = smov 48   ;;  %s4304_s14 = smov 72  }
   0x9   :  { %3884 = vmatpush3.msra.mxu1 %v4372_v4  ;;  %s4305_s15 = smov 104   ;;  %s4306_s16 = smov 40  }
   0xa   :  { %3886 = vmatmul.mubr.msk.f32.vlgmr.msra.gmra.mxu1 %vm36_vm0, %v4379_v5  ;;  %3888 = vmatprep.subr.mxu1 %v4294_v6  ;;  %s4307_s17 = smov 32   ;;  %s4308_s18 = smov 16  }
   0xb   :  { %3890 = vmatprep.mubr.msk.f32.mxu1 %vm4295_vm1, %v4294_v6  ;;  %s4309_s19 = smov 8   ;;  %s4310_s20 = smov 24  }
   0xc   :  { %s4311_s30 = smov [#allocation2]  }
  0xca   :  { %v3887_v7 = vpop.f32.mrf.mxu1 }
  0xcb   :  { %v4398_v11 = vadd.f32 %v3887_v7, %v3658_v8 }
  0xcc   :  { %v109_v9 = vpop.f32.mrf.mxu1 }
  0xcd   :  { %v4394_v10 = vadd.f32 %v3658_v8, %v109_v9  ;;  %v4413_v15 = vmul.f32 0.35355338, %v4398_v11 }
  0xcf   :  { %121 = vrot.lane.b32.xlu0 %v4394_v10, %s4296_s6  ;;  %v4405_v13 = vmul.f32 0.35355338, %v4394_v10 }
  0xd3   :  { %200 = vrot.lane.b32.xlu0 %v4398_v11, %s4296_s6 }
 0x141   :  { %v122_v12 = vpop.permute.xlu0 %121 }
 0x142   :  { %3889 = vmatpush3.xpose.msk.msra.mxu1 %vm123_vm2, %v122_v12 }
 0x143   :  { %3893 = vmatprep.subr.mxu1 %v4294_v6 }
 0x145   :  { %v201_v14 = vpop.permute.xlu0 %200  ;;  %3891 = vmatmul.mubr.msk.f32.vlgmr.msra.gmra.mxu1 %vm123_vm2, %v4405_v13 }
 0x146   :  { %3894 = vmatpush3.xpose.msk.msra.mxu1 %vm123_vm2, %v201_v14  ;;  %3895 = vmatprep.mubr.msk.f32.mxu1 %vm4295_vm1, %v4294_v6 }
 0x147   :  { %3903 = vmatprep.subr.mxu1 %v4294_v6 }
 0x149   :  { %3896 = vmatmul.mubr.msk.f32.vlgmr.msra.gmra.mxu1 %vm123_vm2, %v4413_v15 }
 0x14a   :  { %3905 = vmatprep.mubr.msk.f32.mxu1 %vm4295_vm1, %v4294_v6 }
 0x205   :  { %v195_v16 = vpop.f32.mrf.mxu1 }
 0x206   :  { %v277_v17 = vsel %vm123_vm2, %v195_v16, -inf }
 0x207   :  { %278 = vmax.xlane.f32.xlu1 %v277_v17  ;;  %v3892_v18 = vpop.f32.mrf.mxu1 }
 0x209   :  { %v273_v19 = vpop.f32.mrf.mxu1 }
 0x20a   :  { %v280_v20 = vsel %vm123_vm2, %v273_v19, -inf }
 0x20b   :  { %281 = vmax.xlane.f32.xlu1 %v280_v20  ;;  %v3897_v21 = vpop.f32.mrf.mxu1 }
 0x21c   :  { %299 = vrot.lane.b32.xlu1 %v4394_v10, %s4297_s7 }
 0x220   :  { %375 = vrot.lane.b32.xlu1 %v4398_v11, %s4297_s7 }
 0x224   :  { %453 = vrot.lane.b32.xlu1 %v4394_v10, %s4298_s8 }
 0x228   :  { %531 = vrot.lane.b32.xlu1 %v4398_v11, %s4298_s8 }
 0x290   :  { %v279_v22 = vpop.xlane.xlu1 %278 }
 0x291   :  { %v283_v23 = vsub.f32 %v195_v16, %v279_v22 }
 0x293   :  { %v285_v24 = vmul.f32 1.442695, %v283_v23 }
 0x294   :  { %v282_v25 = vpop.xlane.xlu1 %281 }
 0x295   :  { %4192 = vpow2.f32 %v285_v24  ;;  %v284_v26 = vsub.f32 %v273_v19, %v282_v25 }
 0x297   :  { %v287_v27 = vmul.f32 1.442695, %v284_v26 }
 0x298   :  { %v300_v28 = vpop.permute.xlu1 %299 }
 0x299   :  { %4194 = vpow2.f32 %v287_v27  ;;  %3899 = vmatpush3.msra.mxu0 %v300_v28 }
 0x29a   :  { %3908 = vmatprep.subr.mxu0 %v4294_v6 }
 0x29c   :  { %v376_v29 = vpop.permute.xlu1 %375 }
 0x29d   :  { %3904 = vmatpush3.msra.mxu1 %v376_v29 }
 0x29e   :  { %3913 = vmatprep.subr.mxu1 %v4294_v6 }
 0x2a0   :  { %v454_v34 = vpop.permute.xlu1 %453 }
 0x2a2   :  { %v4193_v30 = vpop.eup %4192 }
 0x2a3   :  { %v289_v31 = vsel %vm123_vm2, %v4193_v30, 0.0 }
 0x2a4   :  { %290 = vadd.xlane.f32.xlu0 %v289_v31  ;;  %v532_v35 = vpop.permute.xlu1 %531 }
 0x2a6   :  { %v4195_v32 = vpop.eup %4194 }
 0x2a7   :  { %v292_v33 = vsel %vm123_vm2, %v4195_v32, 0.0 }
 0x2a8   :  { %293 = vadd.xlane.f32.xlu1 %v292_v33 }
 0x2b9   :  { %529 = vrot.lane.b32.xlu1 %v4413_v15, %s4299_s9 }
 0x2ba   :  { %451 = vrot.lane.b32.xlu0 %v4405_v13, %s4299_s9 }
 0x32d   :  { %v291_v36 = vpop.xlane.xlu0 %290 }
 0x32e   :  { %4196 = vrcp.f32 %v291_v36 }
 0x331   :  { %v294_v37 = vpop.xlane.xlu1 %293  ;;  %v452_v42 = vpop.permute.xlu0 %451 }
 0x332   :  { %4198 = vrcp.f32 %v294_v37 }
 0x335   :  { %v530_v43 = vpop.permute.xlu1 %529 }
 0x33b   :  { %v4197_v38 = vpop.eup %4196 }
 0x33c   :  { %v296_v39 = vmul.f32 %v4197_v38, %v4193_v30 }
 0x33e   :  { %3901 = vmatmul.mubr.msk.f32.vlgmr.msra.gmra.mxu0 %vm123_vm2, %v296_v39 }
 0x33f   :  { %v4199_v40 = vpop.eup %4198  ;;  %3909 = vmatpush3.xpose.msk.msra.mxu0 %vm123_vm2, %v454_v34  ;;  %3910 = vmatprep.mubr.msk.f32.mxu0 %vm4295_vm1, %v4294_v6 }
 0x340   :  { %v298_v41 = vmul.f32 %v4199_v40, %v4195_v32  ;;  %3918 = vmatprep.subr.mxu0 %v4294_v6 }
 0x342   :  { %3906 = vmatmul.mubr.msk.f32.vlgmr.msra.gmra.mxu1 %vm123_vm2, %v298_v41  ;;  %3911 = vmatmul.mubr.msk.f32.vlgmr.msra.gmra.mxu0 %vm123_vm2, %v452_v42 }
 0x343   :  { %3914 = vmatpush3.xpose.msk.msra.mxu1 %vm123_vm2, %v532_v35  ;;  %3915 = vmatprep.mubr.msk.f32.mxu1 %vm4295_vm1, %v4294_v6 }
 0x344   :  { %3923 = vmatprep.subr.mxu1 %v4294_v6  ;;  %3920 = vmatprep.mubr.msk.f32.mxu0 %vm4295_vm1, %v4294_v6 }
 0x346   :  { %3916 = vmatmul.mubr.msk.f32.vlgmr.msra.gmra.mxu1 %vm123_vm2, %v530_v43 }
 0x347   :  { %3925 = vmatprep.mubr.msk.f32.mxu1 %vm4295_vm1, %v4294_v6 }
 0x3fe   :  { %v4452_v44 = vpop.f32.mrf.mxu0 }
 0x400   :  { %v3902_v45 = vpop.f32.mrf.mxu0 }
 0x402   :  { %v4454_v46 = vpop.f32.mrf.mxu1  ;;  %v525_v47 = vpop.f32.mrf.mxu0 }
 0x403   :  { %v607_v48 = vsel %vm123_vm2, %v525_v47, -inf }
 0x404   :  { %608 = vmax.xlane.f32.xlu1 %v607_v48  ;;  %v3907_v49 = vpop.f32.mrf.mxu1  ;;  %v3912_v50 = vpop.f32.mrf.mxu0 }
 0x406   :  { %v603_v51 = vpop.f32.mrf.mxu1 }
 0x407   :  { %v610_v52 = vsel %vm123_vm2, %v603_v51, -inf }
 0x408   :  { %611 = vmax.xlane.f32.xlu0 %v610_v52  ;;  %v3917_v53 = vpop.f32.mrf.mxu1 }
 0x415   :  { %629 = vrot.lane.b32.xlu1 %v4394_v10, %s4300_s10 }
 0x419   :  { %783 = vrot.lane.b32.xlu1 %v4394_v10, %s4301_s11 }
 0x41d   :  { %861 = vrot.lane.b32.xlu1 %v4398_v11, %s4301_s11 }
 0x41e   :  { %705 = vrot.lane.b32.xlu0 %v4398_v11, %s4300_s10 }
 0x422   :  { %781 = vrot.lane.b32.xlu0 %v4405_v13, %s4302_s12 }
 0x48d   :  { %v609_v54 = vpop.xlane.xlu1 %608 }
 0x48e   :  { %v613_v55 = vsub.f32 %v525_v47, %v609_v54 }
 0x490   :  { %v615_v56 = vmul.f32 1.442695, %v613_v55 }
 0x491   :  { %v630_v57 = vpop.permute.xlu1 %629  ;;  %v612_v58 = vpop.xlane.xlu0 %611 }
 0x492   :  { %4200 = vpow2.f32 %v615_v56  ;;  %v614_v59 = vsub.f32 %v603_v51, %v612_v58  ;;  %3919 = vmatpush3.msra.mxu0 %v630_v57 }
 0x493   :  { %3928 = vmatprep.subr.mxu0 %v4294_v6 }
 0x494   :  { %v617_v60 = vmul.f32 1.442695, %v614_v59 }
 0x495   :  { %v706_v61 = vpop.permute.xlu0 %705  ;;  %v784_v9 = vpop.permute.xlu1 %783 }
 0x496   :  { %4202 = vpow2.f32 %v617_v60  ;;  %3924 = vmatpush3.msra.mxu1 %v706_v61 }
 0x497   :  { %3933 = vmatprep.subr.mxu1 %v4294_v6 }
 0x499   :  { %v862_v12 = vpop.permute.xlu1 %861  ;;  %v782_v21 = vpop.permute.xlu0 %781 }
 0x49f   :  { %v4201_v62 = vpop.eup %4200 }
 0x4a0   :  { %v619_v63 = vsel %vm123_vm2, %v4201_v62, 0.0 }
 0x4a1   :  { %620 = vadd.xlane.f32.xlu1 %v619_v63 }
 0x4a3   :  { %v4203_v7 = vpop.eup %4202 }
 0x4a4   :  { %v622_v8 = vsel %vm123_vm2, %v4203_v7, 0.0 }
 0x4a5   :  { %623 = vadd.xlane.f32.xlu1 %v622_v8 }
 0x4b6   :  { %859 = vrot.lane.b32.xlu1 %v4413_v15, %s4302_s12 }
 0x52a   :  { %v621_v14 = vpop.xlane.xlu1 %620 }
 0x52b   :  { %4204 = vrcp.f32 %v621_v14 }
 0x52e   :  { %v624_v16 = vpop.xlane.xlu1 %623 }
 0x52f   :  { %4206 = vrcp.f32 %v624_v16 }
 0x532   :  { %v860_v22 = vpop.permute.xlu1 %859 }
 0x538   :  { %v4205_v17 = vpop.eup %4204 }
 0x539   :  { %v626_v18 = vmul.f32 %v4205_v17, %v4201_v62 }
 0x53b   :  { %3921 = vmatmul.mubr.msk.f32.vlgmr.msra.gmra.mxu0 %vm123_vm2, %v626_v18 }
 0x53c   :  { %v4207_v19 = vpop.eup %4206  ;;  %3929 = vmatpush3.xpose.msk.msra.mxu0 %vm123_vm2, %v784_v9  ;;  %3930 = vmatprep.mubr.msk.f32.mxu0 %vm4295_vm1, %v4294_v6 }
 0x53d   :  { %v628_v20 = vmul.f32 %v4207_v19, %v4203_v7  ;;  %3938 = vmatprep.subr.mxu0 %v4294_v6 }
 0x53f   :  { %3926 = vmatmul.mubr.msk.f32.vlgmr.msra.gmra.mxu1 %vm123_vm2, %v628_v20  ;;  %3931 = vmatmul.mubr.msk.f32.vlgmr.msra.gmra.mxu0 %vm123_vm2, %v782_v21 }
 0x540   :  { %3934 = vmatpush3.xpose.msk.msra.mxu1 %vm123_vm2, %v862_v12  ;;  %3935 = vmatprep.mubr.msk.f32.mxu1 %vm4295_vm1, %v4294_v6 }
 0x541   :  { %3943 = vmatprep.subr.mxu1 %v4294_v6  ;;  %3940 = vmatprep.mubr.msk.f32.mxu0 %vm4295_vm1, %v4294_v6 }
 0x543   :  { %3936 = vmatmul.mubr.msk.f32.vlgmr.msra.gmra.mxu1 %vm123_vm2, %v860_v22 }
 0x544   :  { %3945 = vmatprep.mubr.msk.f32.mxu1 %vm4295_vm1, %v4294_v6 }
 0x5fb   :  { %v4488_v23 = vpop.f32.mrf.mxu0 }
 0x5fd   :  { %v3922_v24 = vpop.f32.mrf.mxu0 }
 0x5ff   :  { %v4490_v25 = vpop.f32.mrf.mxu1  ;;  %v855_v26 = vpop.f32.mrf.mxu0 }
 0x600   :  { %v937_v27 = vsel %vm123_vm2, %v855_v26, -inf }
 0x601   :  { %938 = vmax.xlane.f32.xlu0 %v937_v27  ;;  %v3927_v28 = vpop.f32.mrf.mxu1  ;;  %v3932_v29 = vpop.f32.mrf.mxu0 }
 0x603   :  { %v933_v30 = vpop.f32.mrf.mxu1 }
 0x604   :  { %v940_v31 = vsel %vm123_vm2, %v933_v30, -inf }
 0x605   :  { %941 = vmax.xlane.f32.xlu1 %v940_v31  ;;  %v3937_v32 = vpop.f32.mrf.mxu1 }
 0x616   :  { %959 = vrot.lane.b32.xlu1 %v4394_v10, %s4303_s13 }
 0x617   :  { %1035 = vrot.lane.b32.xlu0 %v4398_v11, %s4303_s13 }
 0x61a   :  { %1113 = vrot.lane.b32.xlu1 %v4394_v10, %s4304_s14 }
 0x61e   :  { %1191 = vrot.lane.b32.xlu1 %v4398_v11, %s4304_s14 }
 0x622   :  { %1189 = vrot.lane.b32.xlu1 %v4413_v15, %s4305_s15 }
 0x68a   :  { %v939_v33 = vpop.xlane.xlu0 %938 }
 0x68b   :  { %v943_v34 = vsub.f32 %v855_v26, %v939_v33 }
 0x68d   :  { %v945_v35 = vmul.f32 1.442695, %v943_v34 }
 0x68e   :  { %v1036_v36 = vpop.permute.xlu0 %1035  ;;  %v942_v37 = vpop.xlane.xlu1 %941 }
 0x68f   :  { %4208 = vpow2.f32 %v945_v35  ;;  %v944_v38 = vsub.f32 %v933_v30, %v942_v37  ;;  %3944 = vmatpush3.msra.mxu1 %v1036_v36 }
 0x690   :  { %3953 = vmatprep.subr.mxu1 %v4294_v6 }
 0x691   :  { %v947_v39 = vmul.f32 1.442695, %v944_v38 }
 0x692   :  { %v960_v40 = vpop.permute.xlu1 %959 }
 0x693   :  { %4210 = vpow2.f32 %v947_v39  ;;  %3939 = vmatpush3.msra.mxu0 %v960_v40 }
 0x694   :  { %3948 = vmatprep.subr.mxu0 %v4294_v6 }
 0x696   :  { %v1114_v48 = vpop.permute.xlu1 %1113 }
 0x69a   :  { %v1192_v52 = vpop.permute.xlu1 %1191 }
 0x69c   :  { %v4209_v41 = vpop.eup %4208 }
 0x69d   :  { %v949_v42 = vsel %vm123_vm2, %v4209_v41, 0.0 }
 0x69e   :  { %950 = vadd.xlane.f32.xlu0 %v949_v42  ;;  %v1190_v54 = vpop.permute.xlu1 %1189 }
 0x6a0   :  { %v4211_v15 = vpop.eup %4210 }
 0x6a1   :  { %v952_v43 = vsel %vm123_vm2, %v4211_v15, 0.0 }
 0x6a2   :  { %953 = vadd.xlane.f32.xlu0 %v952_v43 }
 0x6b8   :  { %1111 = vrot.lane.b32.xlu0 %v4405_v13, %s4305_s15 }
 0x727   :  { %v951_v45 = vpop.xlane.xlu0 %950 }
 0x728   :  { %4212 = vrcp.f32 %v951_v45 }
 0x72b   :  { %v954_v47 = vpop.xlane.xlu0 %953 }
 0x72c   :  { %4214 = vrcp.f32 %v954_v47 }
 0x72f   :  { %v1112_v13 = vpop.permute.xlu0 %1111 }
 0x735   :  { %v4213_v49 = vpop.eup %4212 }
 0x736   :  { %v956_v50 = vmul.f32 %v4213_v49, %v4209_v41 }
 0x738   :  { %3941 = vmatmul.mubr.msk.f32.vlgmr.msra.gmra.mxu0 %vm123_vm2, %v956_v50 }
 0x739   :  { %v4215_v51 = vpop.eup %4214  ;;  %3949 = vmatpush3.xpose.msk.msra.mxu0 %vm123_vm2, %v1114_v48  ;;  %3950 = vmatprep.mubr.msk.f32.mxu0 %vm4295_vm1, %v4294_v6 }
 0x73a   :  { %v958_v53 = vmul.f32 %v4215_v51, %v4211_v15  ;;  %3958 = vmatprep.subr.mxu0 %v4294_v6 }
 0x73c   :  { %3946 = vmatmul.mubr.msk.f32.vlgmr.msra.gmra.mxu1 %vm123_vm2, %v958_v53  ;;  %3951 = vmatmul.mubr.msk.f32.vlgmr.msra.gmra.mxu0 %vm123_vm2, %v1112_v13 }
 0x73d   :  { %3954 = vmatpush3.xpose.msk.msra.mxu1 %vm123_vm2, %v1192_v52  ;;  %3955 = vmatprep.mubr.msk.f32.mxu1 %vm4295_vm1, %v4294_v6 }
 0x73e   :  { %3963 = vmatprep.subr.mxu1 %v4294_v6  ;;  %3960 = vmatprep.mubr.msk.f32.mxu0 %vm4295_vm1, %v4294_v6 }
 0x740   :  { %3956 = vmatmul.mubr.msk.f32.vlgmr.msra.gmra.mxu1 %vm123_vm2, %v1190_v54 }
 0x741   :  { %3965 = vmatprep.mubr.msk.f32.mxu1 %vm4295_vm1, %v4294_v6 }
 0x7f8   :  { %v1031_v55 = vpop.f32.mrf.mxu0 }
 0x7fa   :  { %v3942_v56 = vpop.f32.mrf.mxu0 }
 0x7fc   :  { %v1107_v57 = vpop.f32.mrf.mxu1  ;;  %v1185_v58 = vpop.f32.mrf.mxu0 }
 0x7fd   :  { %v1267_v59 = vsel %vm123_vm2, %v1185_v58, -inf }
 0x7fe   :  { %1268 = vmax.xlane.f32.xlu0 %v1267_v59  ;;  %v3947_v60 = vpop.f32.mrf.mxu1  ;;  %v3952_v61 = vpop.f32.mrf.mxu0 }
 0x800   :  { %v1263_v62 = vpop.f32.mrf.mxu1 }
 0x801   :  { %v1270_v63 = vsel %vm123_vm2, %v1263_v62, -inf }
 0x802   :  { %1271 = vmax.xlane.f32.xlu1 %v1270_v63  ;;  %v3957_v7 = vpop.f32.mrf.mxu1 }
 0x813   :  { %1289 = vrot.lane.b32.xlu1 %v4394_v10, %s4306_s16 }
 0x817   :  { %1492 = vrot.lane.b32.xlu1 %v4346_v0, %s4307_s17 }
 0x81b   :  { %1490 = vrot.lane.b32.xlu1 %v4351_v1, %s4307_s17 }
 0x81f   :  { %1488 = vrot.lane.b32.xlu1 %v4363_v3, %s4307_s17 }
 0x823   :  { %1451 = vrot.lane.b32.xlu1 %v1031_v55, %s4308_s18 }
 0x887   :  { %v1269_v8 = vpop.xlane.xlu0 %1268 }
 0x888   :  { %v1273_v9 = vsub.f32 %v1185_v58, %v1269_v8 }
 0x88a   :  { %v1275_v12 = vmul.f32 1.442695, %v1273_v9 }
 0x88b   :  { %v1272_v14 = vpop.xlane.xlu1 %1271 }
 0x88c   :  { %4216 = vpow2.f32 %v1275_v12  ;;  %v1274_v16 = vsub.f32 %v1263_v62, %v1272_v14  ;;  %v3688_v12 = vld [vmem:[%s5002_s4 + $0x7] ss:$0 sm:$0xff] }
 0x88e   :  { %v1277_v10 = vmul.f32 1.442695, %v1274_v16  ;;  %v3689_v16 = vld [vmem:[%s5002_s4 + $0x8] ss:$0 sm:$0xff] }
 0x88f   :  { %v1290_v17 = vpop.permute.xlu1 %1289 }
 0x890   :  { %4218 = vpow2.f32 %v1277_v10  ;;  %3959 = vmatpush3.msra.mxu0 %v1290_v17 }
 0x893   :  { %v1493_v22 = vpop.permute.xlu1 %1492 }
 0x897   :  { %v1491_v26 = vpop.permute.xlu1 %1490 }
 0x899   :  { %v4217_v0 = vpop.eup %4216 }
 0x89a   :  { %v1279_v18 = vsel %vm123_vm2, %v4217_v0, 0.0 }
 0x89b   :  { %1280 = vadd.xlane.f32.xlu0 %v1279_v18 }
 0x89d   :  { %v4219_v1 = vpop.eup %4218 }
 0x89e   :  { %v1282_v3 = vsel %vm123_vm2, %v4219_v1, 0.0 }
 0x89f   :  { %1283 = vadd.xlane.f32.xlu0 %v1282_v3 }
 0x8b5   :  { %1365 = vrot.lane.b32.xlu0 %v4398_v11, %s4306_s16 }
 0x8b9   :  { %1443 = vrot.lane.b32.xlu0 %v4488_v23, %s4309_s19 }
 0x8bd   :  { %1445 = vrot.lane.b32.xlu0 %v4490_v25, %s4309_s19 }
 0x8c1   :  { %1453 = vrot.lane.b32.xlu0 %v1107_v57, %s4308_s18 }
 0x8c5   :  { %1486 = vrot.lane.b32.xlu0 %v4372_v4, %s4307_s17  ;;  %v1489_v4 = vpop.permute.xlu1 %1488 }
 0x8c9   :  { %v1452_v35 = vpop.permute.xlu1 %1451 }
 0x924   :  { %v1281_v19 = vpop.xlane.xlu0 %1280 }
 0x925   :  { %4220 = vrcp.f32 %v1281_v19 }
 0x928   :  { %v1284_v20 = vpop.xlane.xlu0 %1283 }
 0x929   :  { %4222 = vrcp.f32 %v1284_v20 }
 0x92c   :  { %v1366_v21 = vpop.permute.xlu0 %1365 }
 0x92d   :  { %3964 = vmatpush3.msra.mxu1 %v1366_v21  ;;  %v4593_v21 = vld [vmem:[%s5000_s2 + $0x28] sm:$0xff] }
 0x92e   :  { %3968 = vmatprep.subr.mxu1 %v1493_v22 }
 0x930   :  { %v1444_v27 = vpop.permute.xlu0 %1443 }
 0x931   :  { %v1465_v36 = vsel %vm123_vm2, %v4452_v44, %v1444_v27  ;;  %v3685_v44 = vld [vmem:[%s5002_s4 + $0x2] ss:$0 sm:$0xff] }
 0x932   :  { %v4221_v11 = vpop.eup %4220  ;;  %v1468_v37 = vsel %vm1467_vm3, %v1465_v36, %v1452_v35 }
 0x933   :  { %v1286_v24 = vmul.f32 %v4221_v11, %v4217_v0  ;;  %v4609_v11 = vld [vmem:[%s5000_s2 + $0x10] sm:$0xff] }
 0x934   :  { %v1446_v28 = vpop.permute.xlu0 %1445 }
 0x935   :  { %3961 = vmatmul.mubr.msk.f32.vlgmr.msra.gmra.mxu0 %vm123_vm2, %v1286_v24  ;;  %v1466_v40 = vsel %vm123_vm2, %v4454_v46, %v1446_v28 }
 0x936   :  { %v4223_v23 = vpop.eup %4222 }
 0x937   :  { %v1288_v25 = vmul.f32 %v4223_v23, %v4219_v1 }
 0x938   :  { %v1454_v29 = vpop.permute.xlu0 %1453 }
 0x939   :  { %3966 = vmatmul.mubr.msk.f32.vlgmr.msra.gmra.mxu1 %vm123_vm2, %v1288_v25  ;;  %v1469_v41 = vsel %vm1467_vm3, %v1466_v40, %v1454_v29 }
 0x93a   :  { %3969 = vmatpush3.msra.mxu1 %v1493_v22  ;;  %v4600_v22 = vld [vmem:[%s5000_s2 + $0x40] sm:$0xff] }
 0x93b   :  { %3970 = vmatprep.subr.mxu1 %v1491_v26 }
 0x93c   :  { %3971 = vmatpush3.msra.mxu1 %v1491_v26  ;;  %v1487_v30 = vpop.permute.xlu0 %1486 }
 0x93d   :  { %3972 = vmatprep.subr.mxu1 %v1489_v4 }
 0x93e   :  { %3973 = vmatpush3.msra.mxu1 %v1489_v4 }
 0x93f   :  { %3974 = vmatprep.subr.mxu1 %v1487_v30 }
 0x940   :  { %3975 = vmatpush3.msra.mxu1 %v1487_v30 }
 0x9f5   :  { %v1361_v31 = vpop.f32.mrf.mxu0 }
 0x9f6   :  { %1459 = vrot.lane.b32.xlu1 %v1361_v31, %s4310_s20 }
 0x9f7   :  { %v3962_v32 = vpop.f32.mrf.mxu0 }
 0x9f9   :  { %v1437_v33 = vpop.f32.mrf.mxu1 }
 0x9fa   :  { %1461 = vrot.lane.b32.xlu1 %v1437_v33, %s4310_s20  ;;  %v23_v33 = vld [vmem:[%s4999_s1] sm:$0xff] }
 0x9fb   :  { %v3967_v34 = vpop.f32.mrf.mxu1  ;;  %3998 = vmatprep.mubr.msk.f32.mxu0 %vm36_vm0, %v23_v33 }
 0xa68   :  { %v1460_v38 = vpop.permute.xlu1 %1459 }
 0xa69   :  { %v1471_v39 = vsel %vm1470_vm4, %v1468_v37, %v1460_v38 }
 0xa6a   :  { %3976 = vmatprep.mubr.msk.f32.mxu1 %vm36_vm0, %v1471_v39 }
 0xa6c   :  { %v1462_v42 = vpop.permute.xlu1 %1461 }
 0xa6d   :  { %v1472_v15 = vsel %vm1470_vm4, %v1469_v41, %v1462_v42 }
 0xa6e   :  { %3977 = vmatmul.mubr.msk.f32.vlgmr.msra.gmra.mxu1 %vm36_vm0, %v1472_v15  ;;  %v24_v15 = vld [vmem:[%s4999_s1 + $0x8] sm:$0xff] }
 0xb2e   :  { %v3978_v43 = vpop.f32.mrf.mxu1 }
 0xb2f   :  { %v1576_v45 = vadd.f32 %v3978_v43, %v3685_v44  ;;  %v26_v43 = vld [vmem:[%s4999_s1 + $0x18] sm:$0xff] }
 0xb30   :  { %v1570_v47 = vpop.f32.mrf.mxu1 }
 0xb31   :  { %v1571_v48 = vadd.f32 %v3685_v44, %v1570_v47  ;;  %v1580_v49 = vadd.f32 %v1576_v45, %v4379_v5  ;;  %v25_v44 = vld [vmem:[%s4999_s1 + $0x10] sm:$0xff]  ;;  %v4641_v47 = vld [vmem:[%s5002_s4 + $0x9] ss:$0 sm:$0xff]  ;;  %s3647_s1 = sshll.u32 %s4311_s30, 4  ;;  %s3648_s1 = int_to_ptr.vmem [resolvable:$true] %s3647_s1 }
 0xb32   :  { %s4272_s7 = scalar_lea.vmem %s3648_s1, 256  ;;  %p4277_p1 = scmp.lt.s32.totalorder %s3648_s1, %s3648_s1 }
 0xb33   :  { %v1586_v50 = vsel %vm36_vm0, %v1580_v49, 0.0  ;;  %v1579_v46 = vadd.f32 %v1571_v48, %v4357_v2  ;;  %v4570_v2 = vld [vmem:[%s5000_s2 + $0x58] sm:$0xff]  ;;  %p4273_p0 = scmp.ne.s32.totalorder %s3648_s1, %s4272_s7  ;;  %p4278_p2 = scmp.lt.s32.totalorder %s4272_s7, %s4272_s7 }
 0xb34   :  { %1587 = vadd.xlane.f32.xlu1 %v1586_v50  ;;  %3979 = vmatprep.subr.mxu1 %v4570_v2 }
 0xb35   :  { %v1583_v51 = vsel %vm36_vm0, %v1579_v46, 0.0  ;;  %3980 = vmatpush3.msra.mxu1 %v4570_v2  ;;  %p4279_p3 = por %p4278_p2, %p4277_p1 }
 0xb36   :  { %1584 = vadd.xlane.f32.xlu0 %v1583_v51  ;;  %3981 = vmatprep.subr.mxu1 %v4600_v22 }
 0xb37   :  { %3982 = vmatpush3.msra.mxu1 %v4600_v22  ;;  %p4280_p4 = pnand %p4279_p3, %p4273_p0 }
 0xb38   :  { %3983 = vmatprep.subr.mxu1 %v4593_v21 }
 0xb39   :  { %3984 = vmatpush3.msra.mxu1 %v4593_v21 }
 0xb3a   :  { %3985 = vmatprep.subr.mxu1 %v4609_v11 }
 0xb3b   :  { %3986 = vmatpush3.msra.mxu1 %v4609_v11 }
 0xb3c   :  { %4004 = vmatprep.subr.mxu1 %v4294_v6 }
 0xbbd   :  { %v1588_v52 = vpop.xlane.xlu1 %1587 }
 0xbbe   :  { %v1591_v53 = vmul.f32 0.03125, %v1588_v52 }
 0xbbf   :  { %v1585_v13 = vpop.xlane.xlu0 %1584 }
 0xbc0   :  { %v1590_v54 = vmul.f32 0.03125, %v1585_v13  ;;  %v1593_v55 = vsub.f32 %v1580_v49, %v1591_v53  ;;  %v4647_v49 = vld [vmem:[%s5002_s4 + $0xa] ss:$0 sm:$0xff] }
 0xbc2   :  { %v1592_v56 = vsub.f32 %v1579_v46, %v1590_v54  ;;  %v1595_v59 = vmul.f32 %v1593_v55, %v1593_v55  ;;  %v3695_v54 = vld [vmem:[%s5002_s4 + $0x4] ss:$0 sm:$0xff] }
 0xbc4   :  { %v1594_v57 = vmul.f32 %v1592_v56, %v1592_v56  ;;  %v1599_v5 = vsel %vm36_vm0, %v1595_v59, 0.0 }
 0xbc6   :  { %v1596_v58 = vsel %vm36_vm0, %v1594_v57, 0.0 }
 0xbc7   :  { %1597 = vadd.xlane.f32.xlu0 %v1596_v58 }
 0xbcb   :  { %1600 = vadd.xlane.f32.xlu0 %v1599_v5 }
 0xc50   :  { %v1598_v60 = vpop.xlane.xlu0 %1597 }
 0xc51   :  { %v1602_v61 = vmul.f32 0.03125, %v1598_v60 }
 0xc53   :  { %v1604_v62 = vadd.f32 1e-05, %v1602_v61 }
 0xc54   :  { %v1601_v63 = vpop.xlane.xlu0 %1600 }
 0xc55   :  { %4224 = vrsqrt.f32 %v1604_v62  ;;  %v1603_v7 = vmul.f32 0.03125, %v1601_v63  ;;  %v3692_v62 = vld [vmem:[%s5002_s4 + $0x3] ss:$0 sm:$0xff] }
 0xc57   :  { %v1605_v8 = vadd.f32 1e-05, %v1603_v7 }
 0xc59   :  { %4226 = vrsqrt.f32 %v1605_v8 }
 0xc62   :  { %v4225_v9 = vpop.eup %4224 }
 0xc63   :  { %v1608_v14 = vmul.f32 %v4225_v9, %v1592_v56 }
 0xc65   :  { %v1614_v10 = vmul.f32 %v3688_v12, %v1608_v14 }
 0xc66   :  { %v4227_v17 = vpop.eup %4226 }
 0xc67   :  { %v4580_v0 = vadd.f32 %v3689_v16, %v1614_v10  ;;  %v1609_v18 = vmul.f32 %v4227_v17, %v1593_v55 }
 0xc69   :  { %v1624_v1 = vsel %vm36_vm0, %v4580_v0, 0.0  ;;  %v1615_v3 = vmul.f32 %v3688_v12, %v1609_v18 }
 0xc6a   :  { %1625 = vadd.xlane.f32.xlu1 %v1624_v1 }
 0xc6b   :  { %v4584_v19 = vadd.f32 %v3689_v16, %v1615_v3 }
 0xc6d   :  { %v1627_v20 = vsel %vm36_vm0, %v4584_v19, 0.0 }
 0xc6e   :  { %1628 = vadd.xlane.f32.xlu0 %v1627_v20 }
 0xc7b   :  { %1767 = vrot.lane.b32.xlu1 %v4570_v2, %s4296_s6 }
 0xc7f   :  { %1763 = vrot.lane.b32.xlu1 %v4593_v21, %s4296_s6 }
 0xcf3   :  { %v1626_v24 = vpop.xlane.xlu1 %1625 }
 0xcf4   :  { %v1630_v23 = vmul.f32 0.03125, %v1626_v24 }
 0xcf6   :  { %v1632_v26 = vsub.f32 %v4580_v0, %v1630_v23 }
 0xcf7   :  { %v1629_v25 = vpop.xlane.xlu0 %1628  ;;  %v1768_v4 = vpop.permute.xlu1 %1767 }
 0xcf8   :  { %v1631_v27 = vmul.f32 0.03125, %v1629_v25  ;;  %v1634_v28 = vmul.f32 %v1632_v26, %v1632_v26  ;;  %3990 = vmatprep.subr.mxu0 %v1768_v4 }
 0xcf9   :  { %3991 = vmatpush3.msra.mxu0 %v1768_v4 }
 0xcfa   :  { %v1633_v29 = vsub.f32 %v4584_v19, %v1631_v27  ;;  %v1636_v30 = vsel %vm36_vm0, %v1634_v28, 0.0 }
 0xcfb   :  { %1637 = vadd.xlane.f32.xlu1 %v1636_v30  ;;  %v1764_v34 = vpop.permute.xlu1 %1763 }
 0xcfc   :  { %v1635_v31 = vmul.f32 %v1633_v29, %v1633_v29 }
 0xcfe   :  { %v1639_v32 = vsel %vm36_vm0, %v1635_v31, 0.0 }
 0xcff   :  { %1640 = vadd.xlane.f32.xlu0 %v1639_v32 }
 0xd0c   :  { %1761 = vrot.lane.b32.xlu1 %v4609_v11, %s4296_s6 }
 0xd15   :  { %1765 = vrot.lane.b32.xlu0 %v4600_v22, %s4296_s6 }
 0xd84   :  { %v1638_v35 = vpop.xlane.xlu1 %1637 }
 0xd85   :  { %v1642_v36 = vmul.f32 0.03125, %v1638_v35 }
 0xd87   :  { %v1644_v37 = vadd.f32 1e-05, %v1642_v36 }
 0xd88   :  { %v1641_v38 = vpop.xlane.xlu0 %1640  ;;  %v1762_v42 = vpop.permute.xlu1 %1761 }
 0xd89   :  { %4228 = vrsqrt.f32 %v1644_v37  ;;  %v1643_v39 = vmul.f32 0.03125, %v1641_v38 }
 0xd8b   :  { %v1645_v40 = vadd.f32 1e-05, %v1643_v39 }
 0xd8c   :  { %v1766_v41 = vpop.permute.xlu0 %1765 }
 0xd8d   :  { %4230 = vrsqrt.f32 %v1645_v40  ;;  %3992 = vmatprep.subr.mxu0 %v1766_v41 }
 0xd8e   :  { %3993 = vmatpush3.msra.mxu0 %v1766_v41 }
 0xd8f   :  { %3994 = vmatprep.subr.mxu0 %v1764_v34 }
 0xd90   :  { %3995 = vmatpush3.msra.mxu0 %v1764_v34 }
 0xd91   :  { %3996 = vmatprep.subr.mxu0 %v1762_v42 }
 0xd92   :  { %3997 = vmatpush3.msra.mxu0 %v1762_v42 }
 0xd93   :  { %3999 = vmatmul.mubr.msk.f32.vlgmr.msra.gmra.mxu0 %vm36_vm0, %v24_v15  ;;  %4011 = vmatprep.subr.mxu0 %v4294_v6 }
 0xd94   :  { %4001 = vmatprep.mubr.msk.f32.mxu0 %vm36_vm0, %v25_v44 }
 0xd96   :  { %v4229_v45 = vpop.eup %4228 }
 0xd97   :  { %4002 = vmatmul.mubr.msk.f32.gmra.mxu0 %vm36_vm0, %v26_v43  ;;  %v1648_v48 = vmul.f32 %v4229_v45, %v1632_v26 }
 0xd98   :  { %4015 = vmatprep.mubr.msk.f32.mxu0 %vm4295_vm1, %v4294_v6 }
 0xd99   :  { %v1654_v50 = vmul.f32 %v4641_v47, %v1648_v48 }
 0xd9a   :  { %v4231_v46 = vpop.eup %4230 }
 0xd9b   :  { %v1649_v51 = vmul.f32 %v4231_v46, %v1633_v29  ;;  %v1660_v52 = vadd.f32 %v4647_v49, %v1654_v50 }
 0xd9d   :  { %3987 = vmatprep.mubr.msk.f32.mxu1 %vm36_vm0, %v1660_v52  ;;  %v1655_v53 = vmul.f32 %v4641_v47, %v1649_v51 }
 0xd9f   :  { %v1661_v13 = vadd.f32 %v4647_v49, %v1655_v53 }
 0xda1   :  { %3988 = vmatmul.mubr.msk.f32.vlgmr.msra.gmra.mxu1 %vm36_vm0, %v1661_v13 }
 0xda2   :  { %4008 = vmatprep.mubr.msk.f32.mxu1 %vm4295_vm1, %v4294_v6 }
 0xe53   :  { %v4000_v55 = vpop.f32.mrf.mxu0 }
 0xe54   :  { %v4662_v56 = vadd.f32 %v4000_v55, %v3695_v54 }
 0xe55   :  { %v1851_v57 = vpop.f32.mrf.mxu0 }
 0xe56   :  { %v4664_v58 = vadd.f32 %v3695_v54, %v1851_v57  ;;  %4005 = vmatpush3.xpose.msk.msra.mxu1 %vm123_vm2, %v4662_v56 }
 0xe57   :  { %v4003_v59 = vpop.f32.mrf.mxu0  ;;  %4006 = vmatprep.subr.mxu1 %v4294_v6 }
 0xe58   :  { %v4669_v5 = vadd.f32 %v4003_v59, %v3695_v54 }
 0xe59   :  { %v1861_v60 = vpop.f32.mrf.mxu0 }
 0xe5a   :  { %4007 = vmatpush3.xpose.msk.msra.mxu1 %vm123_vm2, %v4664_v58  ;;  %4012 = vmatpush3.xpose.msk.msra.mxu0 %vm123_vm2, %v4669_v5  ;;  %v4675_v61 = vadd.f32 %v3695_v54, %v1861_v60 }
 0xe5b   :  { %4013 = vmatprep.subr.mxu0 %v4294_v6  ;;  %4018 = vmatprep.subr.mxu1 %v4294_v6 }
 0xe5e   :  { %4014 = vmatpush3.xpose.msk.msra.mxu0 %vm123_vm2, %v4675_v61 }
 0xe5f   :  { %4032 = vmatprep.subr.mxu0 %v4294_v6 }
 0xe61   :  { %v3989_v63 = vpop.f32.mrf.mxu1 }
 0xe62   :  { %v1749_v7 = vadd.f32 %v3989_v63, %v3692_v62 }
 0xe63   :  { %v1743_v8 = vpop.f32.mrf.mxu1 }
 0xe64   :  { %v4685_v9 = vmul.f32 0.35355338, %v1749_v7  ;;  %v1744_v12 = vadd.f32 %v3692_v62, %v1743_v8 }
 0xe66   :  { %v4687_v14 = vmul.f32 0.35355338, %v1744_v12  ;;  %4016 = vmatmul.mubr.msk.f32.vlgmr.msra.gmra.mxu0 %vm123_vm2, %v4685_v9 }
 0xe67   :  { %4036 = vmatprep.mubr.msk.f32.mxu0 %vm4295_vm1, %v4294_v6 }
 0xe68   :  { %4009 = vmatmul.mubr.msk.f32.vlgmr.msra.gmra.mxu1 %vm123_vm2, %v4687_v14 }
 0xe69   :  { %4022 = vmatprep.mubr.msk.f32.mxu1 %vm4295_vm1, %v4294_v6 }
 0xf26   :  { %v2026_v16 = vpop.f32.mrf.mxu0 }
 0xf27   :  { %v2033_v10 = vsel %vm1467_vm3, %v2026_v16, -inf }
 0xf28   :  { %2034 = vmax.xlane.f32.xlu1 %v2033_v10  ;;  %v1947_v17 = vpop.f32.mrf.mxu1  ;;  %v4017_v18 = vpop.f32.mrf.mxu0 }
 0xf29   :  { %v2030_v1 = vsel %vm1467_vm3, %v1947_v17, -inf }
 0xf2a   :  { %2031 = vmax.xlane.f32.xlu0 %v2030_v1  ;;  %v4010_v3 = vpop.f32.mrf.mxu1 }
 0xf39   :  { %2054 = vrot.lane.b32.xlu1 %v4662_v56, %s4296_s6 }
 0xf3d   :  { %2133 = vrot.lane.b32.xlu1 %v4669_v5, %s4296_s6 }
 0xf40   :  { %2052 = vrot.lane.b32.xlu0 %v4664_v58, %s4296_s6 }
 0xf41   :  { %2131 = vrot.lane.b32.xlu1 %v4675_v61, %s4296_s6 }
 0xf45   :  { %2296 = vrot.lane.b32.xlu1 %v4669_v5, %s4299_s9 }
 0xf49   :  { %2294 = vrot.lane.b32.xlu1 %v4675_v61, %s4299_s9 }
 0xf4d   :  { %2292 = vrot.lane.b32.xlu1 %v4685_v9, %s4299_s9 }
 0xfb1   :  { %v2035_v20 = vpop.xlane.xlu1 %2034 }
 0xfb2   :  { %v2037_v24 = vsub.f32 %v2026_v16, %v2035_v20 }
 0xfb3   :  { %v2032_v23 = vpop.xlane.xlu0 %2031 }
 0xfb4   :  { %v2040_v26 = vmul.f32 1.442695, %v2037_v24  ;;  %v2036_v25 = vsub.f32 %v1947_v17, %v2032_v23 }
 0xfb5   :  { %v2055_v4 = vpop.permute.xlu1 %2054 }
 0xfb6   :  { %4232 = vpow2.f32 %v2040_v26  ;;  %v2038_v27 = vmul.f32 1.442695, %v2036_v25  ;;  %4019 = vmatpush3.msra.mxu1 %v2055_v4 }
 0xfb7   :  { %4020 = vmatprep.subr.mxu1 %v4294_v6  ;;  %v2053_v28 = vpop.permute.xlu0 %2052 }
 0xfb8   :  { %4234 = vpow2.f32 %v2038_v27  ;;  %4021 = vmatpush3.msra.mxu1 %v2053_v28 }
 0xfb9   :  { %4025 = vmatprep.subr.mxu1 %v4294_v6  ;;  %v2134_v35 = vpop.permute.xlu1 %2133 }
 0xfbd   :  { %v2132_v38 = vpop.permute.xlu1 %2131 }
 0xfc1   :  { %v2297_v15 = vpop.permute.xlu1 %2296 }
 0xfc3   :  { %v4233_v29 = vpop.eup %4232 }
 0xfc4   :  { %v2045_v30 = vsel %vm1467_vm3, %v4233_v29, 0.0 }
 0xfc5   :  { %v4235_v31 = vpop.eup %4234  ;;  %2046 = vadd.xlane.f32.xlu0 %v2045_v30  ;;  %v2295_v43 = vpop.permute.xlu1 %2294 }
 0xfc6   :  { %v2042_v32 = vsel %vm1467_vm3, %v4235_v31, 0.0 }
 0xfc9   :  { %2043 = vadd.xlane.f32.xlu0 %v2042_v32  ;;  %v2293_v45 = vpop.permute.xlu1 %2292 }
 0xfdf   :  { %2214 = vrot.lane.b32.xlu0 %v4662_v56, %s4299_s9 }
 0xfe3   :  { %2212 = vrot.lane.b32.xlu0 %v4664_v58, %s4299_s9 }
 0xfe7   :  { %2210 = vrot.lane.b32.xlu0 %v4687_v14, %s4299_s9 }
0x104e   :  { %v2047_v33 = vpop.xlane.xlu0 %2046 }
0x1052   :  { %v2044_v34 = vpop.xlane.xlu0 %2043 }
0x1053   :  { %4236 = vrcp.f32 %v2044_v34 }
0x1054   :  { %4238 = vrcp.f32 %v2047_v33 }
0x1056   :  { %v2215_v36 = vpop.permute.xlu0 %2214 }
0x1057   :  { %4033 = vmatpush3.xpose.msk.msra.mxu0 %vm123_vm2, %v2215_v36 }
0x1058   :  { %4034 = vmatprep.subr.mxu0 %v4294_v6 }
0x105a   :  { %v2213_v37 = vpop.permute.xlu0 %2212 }
0x105b   :  { %4035 = vmatpush3.xpose.msk.msra.mxu0 %vm123_vm2, %v2213_v37 }
0x105c   :  { %4046 = vmatprep.subr.mxu0 %v4294_v6 }
0x105e   :  { %v2211_v39 = vpop.permute.xlu0 %2210 }
0x105f   :  { %4037 = vmatmul.mubr.msk.f32.vlgmr.msra.gmra.mxu0 %vm123_vm2, %v2211_v39 }
0x1060   :  { %v4237_v40 = vpop.eup %4236  ;;  %4050 = vmatprep.mubr.msk.f32.mxu0 %vm4295_vm1, %v4294_v6 }
0x1061   :  { %v2049_v41 = vmul.f32 %v4237_v40, %v4235_v31  ;;  %v4239_v42 = vpop.eup %4238 }
0x1062   :  { %v2051_v44 = vmul.f32 %v4239_v42, %v4233_v29 }
0x1063   :  { %4023 = vmatmul.mubr.msk.f32.vlgmr.msra.gmra.mxu1 %vm1467_vm3, %v2049_v41 }
0x1064   :  { %4026 = vmatpush3.msra.mxu1 %v2134_v35  ;;  %4029 = vmatprep.mubr.msk.f32.mxu1 %vm4295_vm1, %v4294_v6 }
0x1065   :  { %4027 = vmatprep.subr.mxu1 %v4294_v6 }
0x1066   :  { %4028 = vmatpush3.msra.mxu1 %v2132_v38 }
0x1067   :  { %4039 = vmatprep.subr.mxu1 %v4294_v6  ;;  %4030 = vmatmul.mubr.msk.f32.vlgmr.msra.gmra.mxu1 %vm1467_vm3, %v2051_v44 }
0x1068   :  { %4040 = vmatpush3.xpose.msk.msra.mxu1 %vm123_vm2, %v2297_v15  ;;  %4043 = vmatprep.mubr.msk.f32.mxu1 %vm4295_vm1, %v4294_v6 }
0x1069   :  { %4041 = vmatprep.subr.mxu1 %v4294_v6 }
0x106c   :  { %4042 = vmatpush3.xpose.msk.msra.mxu1 %vm123_vm2, %v2295_v43 }
0x106d   :  { %4053 = vmatprep.subr.mxu1 %v4294_v6 }
0x106f   :  { %4044 = vmatmul.mubr.msk.f32.vlgmr.msra.gmra.mxu1 %vm123_vm2, %v2293_v45 }
0x1070   :  { %4057 = vmatprep.mubr.msk.f32.mxu1 %vm4295_vm1, %v4294_v6 }
0x111f   :  { %v2288_v48 = vpop.f32.mrf.mxu0 }
0x1120   :  { %v2374_v50 = vsel %vm1467_vm3, %v2288_v48, -inf }
0x1121   :  { %2375 = vmax.xlane.f32.xlu0 %v2374_v50  ;;  %v4038_v46 = vpop.f32.mrf.mxu0 }
0x1123   :  { %v4746_v51 = vpop.f32.mrf.mxu1 }
0x1125   :  { %v4024_v52 = vpop.f32.mrf.mxu1 }
0x1127   :  { %v4748_v53 = vpop.f32.mrf.mxu1 }
0x1129   :  { %v4031_v13 = vpop.f32.mrf.mxu1 }
0x112f   :  { %v2370_v54 = vpop.f32.mrf.mxu1 }
0x1130   :  { %v2377_v55 = vsel %vm1467_vm3, %v2370_v54, -inf }
0x1131   :  { %2378 = vmax.xlane.f32.xlu1 %v2377_v55  ;;  %v4045_v57 = vpop.f32.mrf.mxu1 }
0x1142   :  { %2398 = vrot.lane.b32.xlu1 %v4662_v56, %s4298_s8 }
0x1146   :  { %2396 = vrot.lane.b32.xlu1 %v4664_v58, %s4298_s8 }
0x114a   :  { %2475 = vrot.lane.b32.xlu1 %v4675_v61, %s4298_s8 }
0x114e   :  { %2640 = vrot.lane.b32.xlu1 %v4669_v5, %s4302_s12 }
0x1152   :  { %2638 = vrot.lane.b32.xlu1 %v4675_v61, %s4302_s12 }
0x1156   :  { %2636 = vrot.lane.b32.xlu1 %v4685_v9, %s4302_s12 }
0x11aa   :  { %v2376_v59 = vpop.xlane.xlu0 %2375 }
0x11ab   :  { %v2380_v60 = vsub.f32 %v2288_v48, %v2376_v59 }
0x11ad   :  { %v2382_v62 = vmul.f32 1.442695, %v2380_v60 }
0x11af   :  { %4240 = vpow2.f32 %v2382_v62 }
0x11ba   :  { %v2379_v63 = vpop.xlane.xlu1 %2378 }
0x11bb   :  { %v2381_v10 = vsub.f32 %v2370_v54, %v2379_v63 }
0x11bc   :  { %v4241_v7 = vpop.eup %4240 }
0x11bd   :  { %v2386_v8 = vsel %vm1467_vm3, %v4241_v7, 0.0  ;;  %v2384_v17 = vmul.f32 1.442695, %v2381_v10 }
0x11be   :  { %v2399_v12 = vpop.permute.xlu1 %2398  ;;  %2387 = vadd.xlane.f32.xlu0 %v2386_v8 }
0x11bf   :  { %4047 = vmatpush3.msra.mxu0 %v2399_v12  ;;  %4242 = vpow2.f32 %v2384_v17 }
0x11c0   :  { %4048 = vmatprep.subr.mxu0 %v4294_v6 }
0x11c2   :  { %v2397_v16 = vpop.permute.xlu1 %2396 }
0x11c3   :  { %4049 = vmatpush3.msra.mxu0 %v2397_v16 }
0x11c4   :  { %4060 = vmatprep.subr.mxu0 %v4294_v6 }
0x11c6   :  { %v2476_v24 = vpop.permute.xlu1 %2475 }
0x11ca   :  { %v2641_v29 = vpop.permute.xlu1 %2640 }
0x11cc   :  { %v4243_v18 = vpop.eup %4242 }
0x11cd   :  { %v2389_v1 = vsel %vm1467_vm3, %v4243_v18, 0.0 }
0x11ce   :  { %v2639_v32 = vpop.permute.xlu1 %2638 }
0x11d2   :  { %v2637_v33 = vpop.permute.xlu1 %2636 }
0x11d4   :  { %2477 = vrot.lane.b32.xlu0 %v4669_v5, %s4298_s8 }
0x11d8   :  { %2558 = vrot.lane.b32.xlu0 %v4662_v56, %s4302_s12 }
0x11f7   :  { %2390 = vadd.xlane.f32.xlu0 %v2389_v1 }
0x120d   :  { %2556 = vrot.lane.b32.xlu0 %v4664_v58, %s4302_s12 }
0x1211   :  { %2554 = vrot.lane.b32.xlu0 %v4687_v14, %s4302_s12 }
0x1247   :  { %v2388_v3 = vpop.xlane.xlu0 %2387 }
0x1248   :  { %4244 = vrcp.f32 %v2388_v3 }
0x124b   :  { %v2478_v20 = vpop.permute.xlu0 %2477 }
0x124c   :  { %4054 = vmatpush3.msra.mxu1 %v2478_v20 }
0x124d   :  { %4055 = vmatprep.subr.mxu1 %v4294_v6 }
0x124e   :  { %4056 = vmatpush3.msra.mxu1 %v2476_v24 }
0x124f   :  { %4067 = vmatprep.subr.mxu1 %v4294_v6  ;;  %v2559_v25 = vpop.permute.xlu0 %2558 }
0x1255   :  { %v4245_v23 = vpop.eup %4244 }
0x1256   :  { %v2393_v26 = vmul.f32 %v4245_v23, %v4241_v7 }
0x1258   :  { %4051 = vmatmul.mubr.msk.f32.vlgmr.msra.gmra.mxu0 %vm1467_vm3, %v2393_v26 }
0x1259   :  { %4061 = vmatpush3.xpose.msk.msra.mxu0 %vm123_vm2, %v2559_v25  ;;  %4064 = vmatprep.mubr.msk.f32.mxu0 %vm4295_vm1, %v4294_v6 }
0x125a   :  { %4062 = vmatprep.subr.mxu0 %v4294_v6 }
0x1280   :  { %v2391_v4 = vpop.xlane.xlu0 %2390 }
0x1281   :  { %4246 = vrcp.f32 %v2391_v4 }
0x1284   :  { %v2557_v27 = vpop.permute.xlu0 %2556 }
0x1285   :  { %4063 = vmatpush3.xpose.msk.msra.mxu0 %vm123_vm2, %v2557_v27 }
0x1286   :  { %4074 = vmatprep.subr.mxu0 %v4294_v6 }
0x1288   :  { %v2555_v28 = vpop.permute.xlu0 %2554 }
0x1289   :  { %4065 = vmatmul.mubr.msk.f32.vlgmr.msra.gmra.mxu0 %vm123_vm2, %v2555_v28 }
0x128a   :  { %4078 = vmatprep.mubr.msk.f32.mxu0 %vm4295_vm1, %v4294_v6 }
0x128e   :  { %v4247_v30 = vpop.eup %4246 }
0x128f   :  { %v2395_v31 = vmul.f32 %v4247_v30, %v4243_v18 }
0x1291   :  { %4058 = vmatmul.mubr.msk.f32.vlgmr.msra.gmra.mxu1 %vm1467_vm3, %v2395_v31 }
0x1292   :  { %4068 = vmatpush3.xpose.msk.msra.mxu1 %vm123_vm2, %v2641_v29  ;;  %4071 = vmatprep.mubr.msk.f32.mxu1 %vm4295_vm1, %v4294_v6 }
0x1293   :  { %4069 = vmatprep.subr.mxu1 %v4294_v6 }
0x1296   :  { %4070 = vmatpush3.xpose.msk.msra.mxu1 %vm123_vm2, %v2639_v32 }
0x1297   :  { %4081 = vmatprep.subr.mxu1 %v4294_v6 }
0x1299   :  { %4072 = vmatmul.mubr.msk.f32.vlgmr.msra.gmra.mxu1 %vm123_vm2, %v2637_v33 }
0x129a   :  { %4085 = vmatprep.mubr.msk.f32.mxu1 %vm4295_vm1, %v4294_v6 }
0x1318   :  { %v4797_v34 = vpop.f32.mrf.mxu0 }
0x131a   :  { %v4052_v35 = vpop.f32.mrf.mxu0 }
0x1349   :  { %v2632_v36 = vpop.f32.mrf.mxu0 }
0x134a   :  { %v2718_v37 = vsel %vm1467_vm3, %v2632_v36, -inf }
0x134b   :  { %2719 = vmax.xlane.f32.xlu0 %v2718_v37  ;;  %v4066_v38 = vpop.f32.mrf.mxu0 }
0x1351   :  { %v4800_v39 = vpop.f32.mrf.mxu1 }
0x1353   :  { %v4059_v40 = vpop.f32.mrf.mxu1 }
0x1359   :  { %v2714_v41 = vpop.f32.mrf.mxu1 }
0x135a   :  { %v2721_v42 = vsel %vm1467_vm3, %v2714_v41, -inf }
0x135b   :  { %2722 = vmax.xlane.f32.xlu1 %v2721_v42  ;;  %v4073_v15 = vpop.f32.mrf.mxu1 }
0x136c   :  { %2742 = vrot.lane.b32.xlu1 %v4662_v56, %s4301_s11 }
0x1370   :  { %2740 = vrot.lane.b32.xlu1 %v4664_v58, %s4301_s11 }
0x1374   :  { %2819 = vrot.lane.b32.xlu1 %v4675_v61, %s4301_s11 }
0x1378   :  { %2984 = vrot.lane.b32.xlu1 %v4669_v5, %s4305_s15 }
0x137c   :  { %2982 = vrot.lane.b32.xlu1 %v4675_v61, %s4305_s15 }
0x1380   :  { %2980 = vrot.lane.b32.xlu1 %v4685_v9, %s4305_s15 }
0x13d4   :  { %v2720_v44 = vpop.xlane.xlu0 %2719 }
0x13d5   :  { %v2724_v43 = vsub.f32 %v2632_v36, %v2720_v44 }
0x13d7   :  { %v2726_v45 = vmul.f32 1.442695, %v2724_v43 }
0x13d9   :  { %4248 = vpow2.f32 %v2726_v45 }
0x13e4   :  { %v2723_v48 = vpop.xlane.xlu1 %2722 }
0x13e5   :  { %v2725_v9 = vsub.f32 %v2714_v41, %v2723_v48 }
0x13e6   :  { %v4249_v50 = vpop.eup %4248 }
0x13e7   :  { %v2730_v46 = vsel %vm1467_vm3, %v4249_v50, 0.0  ;;  %v2728_v54 = vmul.f32 1.442695, %v2725_v9 }
0x13e8   :  { %v2743_v52 = vpop.permute.xlu1 %2742  ;;  %2731 = vadd.xlane.f32.xlu0 %v2730_v46 }
0x13e9   :  { %4075 = vmatpush3.msra.mxu0 %v2743_v52  ;;  %4250 = vpow2.f32 %v2728_v54 }
0x13ea   :  { %4076 = vmatprep.subr.mxu0 %v4294_v6 }
0x13ec   :  { %v2741_v13 = vpop.permute.xlu1 %2740 }
0x13ed   :  { %4077 = vmatpush3.msra.mxu0 %v2741_v13 }
0x13ee   :  { %4088 = vmatprep.subr.mxu0 %v4294_v6 }
0x13f0   :  { %v2820_v62 = vpop.permute.xlu1 %2819 }
0x13f4   :  { %v2985_v10 = vpop.permute.xlu1 %2984 }
0x13f6   :  { %v4251_v55 = vpop.eup %4250 }
0x13f7   :  { %v2733_v57 = vsel %vm1467_vm3, %v4251_v55, 0.0 }
0x13f8   :  { %v2983_v1 = vpop.permute.xlu1 %2982 }
0x13fc   :  { %v2981_v3 = vpop.permute.xlu1 %2980 }
0x13fe   :  { %2821 = vrot.lane.b32.xlu0 %v4669_v5, %s4301_s11 }
0x1402   :  { %2902 = vrot.lane.b32.xlu0 %v4662_v56, %s4305_s15 }
0x1421   :  { %2734 = vadd.xlane.f32.xlu0 %v2733_v57 }
0x1437   :  { %2900 = vrot.lane.b32.xlu0 %v4664_v58, %s4305_s15 }
0x143b   :  { %2898 = vrot.lane.b32.xlu0 %v4687_v14, %s4305_s15 }
0x1471   :  { %v2732_v59 = vpop.xlane.xlu0 %2731 }
0x1472   :  { %4252 = vrcp.f32 %v2732_v59 }
0x1475   :  { %v2822_v60 = vpop.permute.xlu0 %2821 }
0x1476   :  { %4082 = vmatpush3.msra.mxu1 %v2822_v60 }
0x1477   :  { %4083 = vmatprep.subr.mxu1 %v4294_v6 }
0x1478   :  { %4084 = vmatpush3.msra.mxu1 %v2820_v62 }
0x1479   :  { %4095 = vmatprep.subr.mxu1 %v4294_v6  ;;  %v2903_v8 = vpop.permute.xlu0 %2902 }
0x147f   :  { %v4253_v63 = vpop.eup %4252 }
0x1480   :  { %v2737_v7 = vmul.f32 %v4253_v63, %v4249_v50 }
0x1482   :  { %4079 = vmatmul.mubr.msk.f32.vlgmr.msra.gmra.mxu0 %vm1467_vm3, %v2737_v7 }
0x1483   :  { %4089 = vmatpush3.xpose.msk.msra.mxu0 %vm123_vm2, %v2903_v8  ;;  %4092 = vmatprep.mubr.msk.f32.mxu0 %vm4295_vm1, %v4294_v6 }
0x1484   :  { %4090 = vmatprep.subr.mxu0 %v4294_v6 }
0x14aa   :  { %v2735_v14 = vpop.xlane.xlu0 %2734 }
0x14ab   :  { %4254 = vrcp.f32 %v2735_v14 }
0x14ae   :  { %v2901_v12 = vpop.permute.xlu0 %2900 }
0x14af   :  { %4091 = vmatpush3.xpose.msk.msra.mxu0 %vm123_vm2, %v2901_v12 }
0x14b0   :  { %4102 = vmatprep.subr.mxu0 %v4294_v6 }
0x14b2   :  { %v2899_v16 = vpop.permute.xlu0 %2898 }
0x14b3   :  { %4093 = vmatmul.mubr.msk.f32.vlgmr.msra.gmra.mxu0 %vm123_vm2, %v2899_v16 }
0x14b4   :  { %4106 = vmatprep.mubr.msk.f32.mxu0 %vm4295_vm1, %v4294_v6 }
0x14b8   :  { %v4255_v17 = vpop.eup %4254 }
0x14b9   :  { %v2739_v18 = vmul.f32 %v4255_v17, %v4251_v55 }
0x14bb   :  { %4086 = vmatmul.mubr.msk.f32.vlgmr.msra.gmra.mxu1 %vm1467_vm3, %v2739_v18 }
0x14bc   :  { %4096 = vmatpush3.xpose.msk.msra.mxu1 %vm123_vm2, %v2985_v10  ;;  %4099 = vmatprep.mubr.msk.f32.mxu1 %vm4295_vm1, %v4294_v6 }
0x14bd   :  { %4097 = vmatprep.subr.mxu1 %v4294_v6 }
0x14c0   :  { %4098 = vmatpush3.xpose.msk.msra.mxu1 %vm123_vm2, %v2983_v1 }
0x14c1   :  { %4109 = vmatprep.subr.mxu1 %v4294_v6 }
0x14c3   :  { %4100 = vmatmul.mubr.msk.f32.vlgmr.msra.gmra.mxu1 %vm123_vm2, %v2981_v3 }
0x14c4   :  { %4113 = vmatprep.mubr.msk.f32.mxu1 %vm4295_vm1, %v4294_v6 }
0x1542   :  { %v2815_v20 = vpop.f32.mrf.mxu0 }
0x1544   :  { %v4080_v24 = vpop.f32.mrf.mxu0 }
0x1573   :  { %v2976_v23 = vpop.f32.mrf.mxu0 }
0x1574   :  { %v3062_v26 = vsel %vm1467_vm3, %v2976_v23, -inf }
0x1575   :  { %3063 = vmax.xlane.f32.xlu0 %v3062_v26  ;;  %v4094_v25 = vpop.f32.mrf.mxu0 }
0x157b   :  { %v2894_v4 = vpop.f32.mrf.mxu1 }
0x157d   :  { %v4087_v27 = vpop.f32.mrf.mxu1 }
0x1583   :  { %v3058_v28 = vpop.f32.mrf.mxu1 }
0x1584   :  { %v3065_v29 = vsel %vm1467_vm3, %v3058_v28, -inf }
0x1585   :  { %3066 = vmax.xlane.f32.xlu1 %v3065_v29  ;;  %v4101_v30 = vpop.f32.mrf.mxu1  ;;  %v3412_v29 = vld [vmem:[%s5000_s2 + $0x30] sm:$0xff] }
0x1586   :  { %v3411_v30 = vld [vmem:[%s5000_s2 + $0x18] sm:$0xff] }
0x1596   :  { %3086 = vrot.lane.b32.xlu1 %v4662_v56, %s4304_s14 }
0x159a   :  { %3084 = vrot.lane.b32.xlu1 %v4664_v58, %s4304_s14 }
0x159e   :  { %3163 = vrot.lane.b32.xlu1 %v4675_v61, %s4304_s14 }
0x15a2   :  { %3289 = vrot.lane.b32.xlu1 %v4600_v22, %s4307_s17 }
0x15a6   :  { %3287 = vrot.lane.b32.xlu1 %v4593_v21, %s4307_s17 }
0x15aa   :  { %3252 = vrot.lane.b32.xlu1 %v2815_v20, %s4308_s18 }
0x15fe   :  { %v3064_v31 = vpop.xlane.xlu0 %3063 }
0x15ff   :  { %v3068_v32 = vsub.f32 %v2976_v23, %v3064_v31  ;;  %v3410_v31 = vld [vmem:[%s5000_s2] sm:$0xff] }
0x1601   :  { %v3070_v33 = vmul.f32 1.442695, %v3068_v32  ;;  %v3517_v32 = vld [vmem:[%s5001_s3 + $0x78] sm:$0xff] }
0x1603   :  { %4256 = vpow2.f32 %v3070_v33  ;;  %v3516_v33 = vld [vmem:[%s5001_s3 + $0x70] sm:$0xff] }
0x160e   :  { %v3067_v35 = vpop.xlane.xlu1 %3066 }
0x160f   :  { %v3069_v56 = vsub.f32 %v3058_v28, %v3067_v35  ;;  %v3413_v28 = vld [vmem:[%s5000_s2 + $0x48] sm:$0xff] }
0x1610   :  { %v4257_v36 = vpop.eup %4256  ;;  %v3515_v35 = vld [vmem:[%s5001_s3 + $0x68] sm:$0xff] }
0x1611   :  { %v3072_v37 = vmul.f32 1.442695, %v3069_v56  ;;  %v3074_v58 = vsel %vm1467_vm3, %v4257_v36, 0.0  ;;  %v3514_v56 = vld [vmem:[%s5001_s3 + $0x60] sm:$0xff] }
0x1612   :  { %v3087_v38 = vpop.permute.xlu1 %3086  ;;  %3075 = vadd.xlane.f32.xlu0 %v3074_v58  ;;  %v3511_v58 = vld [vmem:[%s5001_s3 + $0x48] sm:$0xff] }
0x1613   :  { %4258 = vpow2.f32 %v3072_v37  ;;  %4103 = vmatpush3.msra.mxu0 %v3087_v38  ;;  %v3512_v37 = vld [vmem:[%s5001_s3 + $0x50] sm:$0xff]  ;;  %v3510_v38 = vld [vmem:[%s5001_s3 + $0x40] sm:$0xff] }
0x1614   :  { %4104 = vmatprep.subr.mxu0 %v4294_v6 }
0x1616   :  { %v3085_v22 = vpop.permute.xlu1 %3084 }
0x1617   :  { %4105 = vmatpush3.msra.mxu0 %v3085_v22  ;;  %v3509_v22 = vld [vmem:[%s5001_s3 + $0x38] sm:$0xff] }
0x161a   :  { %v3164_v15 = vpop.permute.xlu1 %3163 }
0x1620   :  { %v4259_v21 = vpop.eup %4258 }
0x1621   :  { %v3077_v61 = vsel %vm1467_vm3, %v4259_v21, 0.0 }
0x1622   :  { %3078 = vadd.xlane.f32.xlu0 %v3077_v61  ;;  %v3507_v61 = vld [vmem:[%s5001_s3 + $0x28] sm:$0xff] }
0x1638   :  { %3165 = vrot.lane.b32.xlu0 %v4669_v5, %s4304_s14 }
0x163c   :  { %3291 = vrot.lane.b32.xlu0 %v4570_v2, %s4307_s17 }
0x1640   :  { %3244 = vrot.lane.b32.xlu0 %v4797_v34, %s4309_s19  ;;  %v3290_v34 = vpop.permute.xlu1 %3289 }
0x1644   :  { %3246 = vrot.lane.b32.xlu0 %v4800_v39, %s4309_s19 }
0x1648   :  { %3254 = vrot.lane.b32.xlu0 %v2894_v4, %s4308_s18 }
0x164c   :  { %3285 = vrot.lane.b32.xlu0 %v4609_v11, %s4307_s17  ;;  %v3288_v11 = vpop.permute.xlu1 %3287 }
0x1650   :  { %v3253_v54 = vpop.permute.xlu1 %3252 }
0x169b   :  { %v3076_v40 = vpop.xlane.xlu0 %3075 }
0x169c   :  { %4260 = vrcp.f32 %v3076_v40  ;;  %v3506_v40 = vld [vmem:[%s5001_s3 + $0x20] sm:$0xff] }
0x16a9   :  { %v4261_v41 = vpop.eup %4260 }
0x16aa   :  { %v3081_v42 = vmul.f32 %v4261_v41, %v4257_v36  ;;  %v3513_v36 = vld [vmem:[%s5001_s3 + $0x58] sm:$0xff] }
0x16ab   :  { %v3079_v5 = vpop.xlane.xlu0 %3078 }
0x16ac   :  { %4262 = vrcp.f32 %v3079_v5  ;;  %4107 = vmatmul.mubr.msk.f32.vlgmr.msra.gmra.mxu0 %vm1467_vm3, %v3081_v42 }
0x16af   :  { %v3166_v2 = vpop.permute.xlu0 %3165 }
0x16b0   :  { %4110 = vmatpush3.msra.mxu1 %v3166_v2 }
0x16b1   :  { %4111 = vmatprep.subr.mxu1 %v4294_v6 }
0x16b2   :  { %4112 = vmatpush3.msra.mxu1 %v3164_v15 }
0x16b3   :  { %v3292_v39 = vpop.permute.xlu0 %3291  ;;  %4127 = vmatprep.subr.mxu1 %v3413_v28 }
0x16b4   :  { %4116 = vmatprep.subr.mxu0 %v3292_v39 }
0x16b5   :  { %4117 = vmatpush3.msra.mxu0 %v3292_v39 }
0x16b6   :  { %4118 = vmatprep.subr.mxu0 %v3290_v34 }
0x16b7   :  { %4119 = vmatpush3.msra.mxu0 %v3290_v34  ;;  %v3245_v45 = vpop.permute.xlu0 %3244 }
0x16b8   :  { %4120 = vmatprep.subr.mxu0 %v3288_v11  ;;  %v3266_v55 = vsel %vm123_vm2, %v4746_v51, %v3245_v45  ;;  %v3732_v51 = vld [vmem:[%s5002_s4 + $0x5] ss:$0 sm:$0xff] }
0x16b9   :  { %v4263_v44 = vpop.eup %4262  ;;  %4121 = vmatpush3.msra.mxu0 %v3288_v11  ;;  %v3268_v57 = vsel %vm1467_vm3, %v3266_v55, %v3253_v54 }
0x16ba   :  { %v3083_v43 = vmul.f32 %v4263_v44, %v4259_v21  ;;  %v3508_v21 = vld [vmem:[%s5001_s3 + $0x30] sm:$0xff] }
0x16bb   :  { %v3247_v48 = vpop.permute.xlu0 %3246 }
0x16bc   :  { %4114 = vmatmul.mubr.msk.f32.vlgmr.msra.gmra.mxu1 %vm1467_vm3, %v3083_v43  ;;  %v3267_v62 = vsel %vm123_vm2, %v4748_v53, %v3247_v48 }
0x16bd   :  { %4128 = vmatpush3.msra.mxu1 %v3413_v28 }
0x16be   :  { %4129 = vmatprep.subr.mxu1 %v3412_v29 }
0x16bf   :  { %v3255_v50 = vpop.permute.xlu0 %3254  ;;  %4130 = vmatpush3.msra.mxu1 %v3412_v29 }
0x16c0   :  { %v3269_v63 = vsel %vm1467_vm3, %v3267_v62, %v3255_v50  ;;  %4131 = vmatprep.subr.mxu1 %v3411_v30  ;;  %v3738_v62 = vld [vmem:[%s5002_s4 + $0x6] ss:$0 sm:$0xff] }
0x16c1   :  { %4132 = vmatpush3.msra.mxu1 %v3411_v30 }
0x16c2   :  { %4133 = vmatprep.subr.mxu1 %v3410_v31 }
0x16c3   :  { %v3286_v46 = vpop.permute.xlu0 %3285  ;;  %4134 = vmatpush3.msra.mxu1 %v3410_v31  ;;  %v3739_v31 = vld [vmem:[%s5002_s4 + $0xb] ss:$0 sm:$0xff] }
0x16c4   :  { %4122 = vmatprep.subr.mxu0 %v3286_v46 }
0x16c5   :  { %4123 = vmatpush3.msra.mxu0 %v3286_v46 }
0x16c6   :  { %4138 = vmatprep.subr.mxu0 %v3517_v32 }
0x176c   :  { %v3159_v6 = vpop.f32.mrf.mxu0 }
0x176d   :  { %3260 = vrot.lane.b32.xlu1 %v3159_v6, %s4310_s20  ;;  %v3505_v6 = vld [vmem:[%s5001_s3 + $0x18] sm:$0xff] }
0x176e   :  { %v4108_v52 = vpop.f32.mrf.mxu0 }
0x176f   :  { %v3504_v52 = vld [vmem:[%s5001_s3 + $0x10] sm:$0xff] }
0x177c   :  { %v3238_v13 = vpop.f32.mrf.mxu1 }
0x177d   :  { %3262 = vrot.lane.b32.xlu1 %v3238_v13, %s4310_s20  ;;  %v3735_v13 = vld [vmem:[%s5002_s4] ss:$0 sm:$0xff] }
0x177e   :  { %v4115_v9 = vpop.f32.mrf.mxu1 }
0x17df   :  { %v3261_v59 = vpop.permute.xlu1 %3260 }
0x17e0   :  { %v3270_v60 = vsel %vm1470_vm4, %v3268_v57, %v3261_v59 }
0x17e1   :  { %4124 = vmatprep.mubr.msk.f32.mxu0 %vm36_vm0, %v3270_v60 }
0x17ef   :  { %v3263_v7 = vpop.permute.xlu1 %3262 }
0x17f0   :  { %v3271_v8 = vsel %vm1470_vm4, %v3269_v63, %v3263_v7 }
0x17f1   :  { %4125 = vmatmul.mubr.msk.f32.vlgmr.msra.gmra.mxu0 %vm36_vm0, %v3271_v8 }
0x17f2   :  { %4139 = vmatpush3.msra.mxu0 %v3517_v32 }
0x17f3   :  { %4140 = vmatprep.subr.mxu0 %v3516_v33 }
0x17f4   :  { %4141 = vmatpush3.msra.mxu0 %v3516_v33 }
0x17f5   :  { %4142 = vmatprep.subr.mxu0 %v3515_v35 }
0x17f6   :  { %4143 = vmatpush3.msra.mxu0 %v3515_v35  ;;  %v3740_v35 = vld [vmem:[%s5002_s4 + $0xc] ss:$0 sm:$0xff] }
0x17f7   :  { %4144 = vmatprep.subr.mxu0 %v3514_v56 }
0x17f8   :  { %4145 = vmatpush3.msra.mxu0 %v3514_v56 }
0x17f9   :  { %4146 = vmatprep.subr.mxu0 %v3513_v36 }
0x17fa   :  { %4147 = vmatpush3.msra.mxu0 %v3513_v36 }
0x17fb   :  { %4148 = vmatprep.subr.mxu0 %v3512_v37 }
0x17fc   :  { %4149 = vmatpush3.msra.mxu0 %v3512_v37 }
0x17fd   :  { %4150 = vmatprep.subr.mxu0 %v3511_v58 }
0x17fe   :  { %4151 = vmatpush3.msra.mxu0 %v3511_v58 }
0x17ff   :  { %4152 = vmatprep.subr.mxu0 %v3510_v38 }
0x1800   :  { %4153 = vmatpush3.msra.mxu0 %v3510_v38 }
0x1801   :  { %4154 = vmatprep.subr.mxu0 %v3509_v22 }
0x1802   :  { %4155 = vmatpush3.msra.mxu0 %v3509_v22 }
0x1803   :  { %4156 = vmatprep.subr.mxu0 %v3508_v21 }
0x1804   :  { %4157 = vmatpush3.msra.mxu0 %v3508_v21 }
0x1805   :  { %4158 = vmatprep.subr.mxu0 %v3507_v61 }
0x1806   :  { %4159 = vmatpush3.msra.mxu0 %v3507_v61 }
0x1807   :  { %4160 = vmatprep.subr.mxu0 %v3506_v40 }
0x1808   :  { %4161 = vmatpush3.msra.mxu0 %v3506_v40 }
0x1809   :  { %4162 = vmatprep.subr.mxu0 %v3505_v6 }
0x180a   :  { %4163 = vmatpush3.msra.mxu0 %v3505_v6 }
0x180b   :  { %4164 = vmatprep.subr.mxu0 %v3504_v52 }
0x180c   :  { %4165 = vmatpush3.msra.mxu0 %v3504_v52 }
0x18b1   :  { %v4126_v14 = vpop.f32.mrf.mxu0 }
0x18b2   :  { %v3375_v12 = vadd.f32 %v4126_v14, %v3732_v51 }
0x18b3   :  { %v3369_v16 = vpop.f32.mrf.mxu0 }
0x18b4   :  { %v3379_v10 = vadd.f32 %v3375_v12, %v4584_v19  ;;  %v3370_v17 = vadd.f32 %v3732_v51, %v3369_v16 }
0x18b6   :  { %v3378_v18 = vadd.f32 %v3370_v17, %v4580_v0  ;;  %v3383_v53 = vsel %vm36_vm0, %v3379_v10, 0.0 }
0x18b7   :  { %3384 = vadd.xlane.f32.xlu1 %v3383_v53 }
0x18b8   :  { %v3380_v1 = vsel %vm36_vm0, %v3378_v18, 0.0 }
0x18b9   :  { %3381 = vadd.xlane.f32.xlu0 %v3380_v1 }
0x1940   :  { %v3385_v3 = vpop.xlane.xlu1 %3384 }
0x1941   :  { %v3387_v20 = vmul.f32 0.03125, %v3385_v3 }
0x1942   :  { %v3382_v24 = vpop.xlane.xlu0 %3381 }
0x1943   :  { %v3386_v23 = vmul.f32 0.03125, %v3382_v24  ;;  %v4898_v26 = vsub.f32 %v3379_v10, %v3387_v20 }
0x1945   :  { %v4900_v25 = vsub.f32 %v3378_v18, %v3386_v23  ;;  %v3391_v0 = vmul.f32 %v4898_v26, %v4898_v26 }
0x1947   :  { %v3390_v19 = vmul.f32 %v4900_v25, %v4900_v25  ;;  %v3395_v27 = vsel %vm36_vm0, %v3391_v0, 0.0 }
0x1949   :  { %v3392_v4 = vsel %vm36_vm0, %v3390_v19, 0.0 }
0x194a   :  { %3393 = vadd.xlane.f32.xlu0 %v3392_v4 }
0x194e   :  { %3396 = vadd.xlane.f32.xlu0 %v3395_v27 }
0x19d3   :  { %v3394_v41 = vpop.xlane.xlu0 %3393 }
0x19d4   :  { %v3398_v42 = vmul.f32 0.03125, %v3394_v41 }
0x19d6   :  { %v3400_v15 = vadd.f32 1e-05, %v3398_v42 }
0x19d7   :  { %v3397_v5 = vpop.xlane.xlu0 %3396 }
0x19d8   :  { %4264 = vrsqrt.f32 %v3400_v15  ;;  %v3399_v2 = vmul.f32 0.03125, %v3397_v5 }
0x19da   :  { %v3401_v34 = vadd.f32 1e-05, %v3399_v2 }
0x19dc   :  { %4266 = vrsqrt.f32 %v3401_v34 }
0x19e5   :  { %v4265_v39 = vpop.eup %4264 }
0x19e6   :  { %v3404_v11 = vmul.f32 %v4265_v39, %v4900_v25 }
0x19e8   :  { %v3406_v44 = vmul.f32 %v4641_v47, %v3404_v11 }
0x19e9   :  { %v4267_v43 = vpop.eup %4266 }
0x19ea   :  { %v3405_v45 = vmul.f32 %v4267_v43, %v4898_v26  ;;  %v3408_v48 = vadd.f32 %v4647_v49, %v3406_v44 }
0x19ec   :  { %4135 = vmatprep.mubr.msk.f32.mxu1 %vm36_vm0, %v3408_v48  ;;  %v3407_v50 = vmul.f32 %v4641_v47, %v3405_v45  ;;  %v3503_v47 = vld [vmem:[%s5001_s3 + $0x8] sm:$0xff] }
0x19ed   :  { %4166 = vmatprep.subr.mxu0 %v3503_v47 }
0x19ee   :  { %v3409_v46 = vadd.f32 %v4647_v49, %v3407_v50  ;;  %4167 = vmatpush3.msra.mxu0 %v3503_v47  ;;  %v3502_v49 = vld [vmem:[%s5001_s3] sm:$0xff] }
0x19ef   :  { %4168 = vmatprep.subr.mxu0 %v3502_v49 }
0x19f0   :  { %4136 = vmatmul.mubr.msk.f32.vlgmr.msra.gmra.mxu1 %vm36_vm0, %v3409_v46  ;;  %4169 = vmatpush3.msra.mxu0 %v3502_v49 }
0x1ab0   :  { %v4137_v9 = vpop.f32.mrf.mxu1 }
0x1ab1   :  { %v3497_v54 = vadd.f32 %v4137_v9, %v3735_v13 }
0x1ab2   :  { %v3491_v55 = vpop.f32.mrf.mxu1 }
0x1ab3   :  { %v3492_v57 = vadd.f32 %v3735_v13, %v3491_v55  ;;  %v3501_v60 = vmax.f32 %v3497_v54, 0.0 }
0x1ab5   :  { %v3500_v59 = vmax.f32 %v3492_v57, 0.0 }
0x1ab7   :  { %4170 = vmatprep.mubr.f32.mxu0 %v3500_v59 }
0x1ab8   :  { %4171 = vmatmul.mubr.f32.vlgmr.msra.gmra.mxu0 %v3501_v60 }
0x1b78   :  { %v4172_v63 = vpop.f32.mrf.mxu0 }
0x1b79   :  { %v3595_v7 = vadd.f32 %v4172_v63, %v3738_v62 }
0x1b7a   :  { %v3589_v8 = vpop.f32.mrf.mxu0 }
0x1b7b   :  { %v3599_v51 = vadd.f32 %v3595_v7, %v3409_v46  ;;  %v3590_v14 = vadd.f32 %v3738_v62, %v3589_v8 }
0x1b7d   :  { %v3598_v12 = vadd.f32 %v3590_v14, %v3408_v48  ;;  %v3605_v16 = vsel %vm36_vm0, %v3599_v51, 0.0 }
0x1b7e   :  { %3606 = vadd.xlane.f32.xlu0 %v3605_v16 }
0x1b7f   :  { %v3602_v10 = vsel %vm36_vm0, %v3598_v12, 0.0 }
0x1b80   :  { %3603 = vadd.xlane.f32.xlu1 %v3602_v10 }
0x1c07   :  { %v3607_v17 = vpop.xlane.xlu0 %3606 }
0x1c08   :  { %v3609_v18 = vmul.f32 0.03125, %v3607_v17 }
0x1c09   :  { %v3604_v53 = vpop.xlane.xlu1 %3603 }
0x1c0a   :  { %v3611_v1 = vsub.f32 %v3599_v51, %v3609_v18  ;;  %v3608_v3 = vmul.f32 0.03125, %v3604_v53 }
0x1c0c   :  { %v3610_v20 = vsub.f32 %v3598_v12, %v3608_v3  ;;  %v3613_v24 = vmul.f32 %v3611_v1, %v3611_v1 }
0x1c0e   :  { %v3617_v23 = vsel %vm36_vm0, %v3613_v24, 0.0  ;;  %v3612_v26 = vmul.f32 %v3610_v20, %v3610_v20 }
0x1c0f   :  { %3618 = vadd.xlane.f32.xlu0 %v3617_v23 }
0x1c10   :  { %v3614_v25 = vsel %vm36_vm0, %v3612_v26, 0.0 }
0x1c11   :  { %3615 = vadd.xlane.f32.xlu1 %v3614_v25 }
0x1c98   :  { %v3619_v19 = vpop.xlane.xlu0 %3618 }
0x1c99   :  { %v3621_v4 = vmul.f32 0.03125, %v3619_v19 }
0x1c9a   :  { %v3616_v0 = vpop.xlane.xlu1 %3615 }
0x1c9b   :  { %v3623_v27 = vadd.f32 1e-05, %v3621_v4  ;;  %v3620_v28 = vmul.f32 0.03125, %v3616_v0 }
0x1c9d   :  { %4268 = vrsqrt.f32 %v3623_v27  ;;  %v3622_v29 = vadd.f32 1e-05, %v3620_v28 }
0x1c9f   :  { %4270 = vrsqrt.f32 %v3622_v29 }
0x1caa   :  { %v4269_v30 = vpop.eup %4268 }
0x1cab   :  { %v3627_v32 = vmul.f32 %v4269_v30, %v3611_v1 }
0x1cac   :  { %v4271_v33 = vpop.eup %4270 }
0x1cad   :  { %v3626_v56 = vmul.f32 %v4271_v33, %v3610_v20  ;;  %v3633_v36 = vmul.f32 %v3739_v31, %v3627_v32 }
0x1caf   :  { %v3632_v37 = vmul.f32 %v3739_v31, %v3626_v56  ;;  %v3639_v58 = vadd.f32 %v3740_v35, %v3633_v36 }
0x1cb1   :  { %v3638_v38 = vadd.f32 %v3740_v35, %v3632_v37  ;;  %3641 = vst.msk [vmem:[#allocation2 + $0x8] sm:$0xff] %vm36_vm0, %v3639_v58 }
0x1cb3   :  { %3640 = vst.msk [vmem:[#allocation2] sm:$0xff] %vm36_vm0, %v3638_v38 }
0x1cb4   :  { %4283 = shalt.err (!%p4280_p4)
}
0x1cb5   :  { %s4312_s4 = smov 128  }
0x1cb6   :  { %3653 = dma.vmem_to_hbm [thread:$0]  %s3648_s1, 256, %s5003_s5, [#allocation3], %s4312_s4, %s4312_s4, %s4309_s19  }
0x1cb7   :  { %4292 = dma.done.wait [#allocation3], 256  }
0x1cb8   :  { %4293 = vsyncadd [#allocation3], 4294967040 }
0x1cb9   :  { %3657 = vsyncpa [#allocation3], 1 }

</bundles_post_ra>
